<compile_context>
chip_gen: v5e
topology: v5e:2x2
jax: 0.10.0
libtpu: 0.0.40
codegen_flags: <defaults>
</compile_context>

<pallas_src>
import functools

import jax
import jax.numpy as jnp
from jax.experimental import pallas as pl
from jax.experimental.pallas import tpu as pltpu

LANE = 128      # lane width; output channels are padded to a multiple of this
TM_CONV = 256   # conv output-row tile
TM_EW = 512     # elementwise output-row tile
BN_EPS = 1e-5


# ----------------------------- Pallas kernels -------------------------------

def _conv_stats_kernel(x_ref, w_ref, o_ref, stats_ref, *, m_total):
    """(tm, K) x (K, Cp) MXU tile + per-tile channel sum / sum-of-squares."""
    acc = jnp.dot(x_ref[...], w_ref[...], preferred_element_type=jnp.float32)
    o_ref[...] = acc

    tm = acc.shape[0]
    if m_total % tm != 0:
        # Ragged final tile: out-of-bounds rows hold undefined data -> mask
        # them out of the BN statistics (their stores are masked by Pallas).
        row = pl.program_id(0) * tm + jax.lax.broadcasted_iota(
            jnp.int32, (tm, 1), 0)
        acc = jnp.where(row < m_total, acc, 0.0)

    s = jnp.sum(acc, axis=0, keepdims=True)             # (1, Cp)
    ss = jnp.sum(acc * acc, axis=0, keepdims=True)      # (1, Cp)
    stats_ref[...] = jnp.concatenate([s, ss], axis=0)   # written once per tile


def _bn_relu_kernel(x_ref, scale_ref, bias_ref, o_ref):
    y = x_ref[...] * scale_ref[...] + bias_ref[...]
    o_ref[...] = jnp.maximum(y, 0.0).astype(o_ref.dtype)


def _bn_add_relu_kernel(x_ref, s_ref, b_ref, sc_ref, scs_ref, scb_ref, o_ref):
    # BN2 affine + shortcut BN affine + residual add + final ReLU, fused.
    y = x_ref[...] * s_ref[...] + b_ref[...]
    y = y + sc_ref[...] * scs_ref[...] + scb_ref[...]
    o_ref[...] = jnp.maximum(y, 0.0).astype(o_ref.dtype)


# ----------------------------- kernel wrappers -------------------------------

def conv_matmul_with_stats(patches, w2d):
    """patches: (M, K) bf16, w2d: (K, Cp) bf16 with Cp % 128 == 0.

    Returns the raw conv output (M, Cp) f32 and per-channel (2, Cp) sum/sumsq.
    """
    m, k = patches.shape
    cp = w2d.shape[1]
    tm = min(TM_CONV, m)
    nt = pl.cdiv(m, tm)
    kern = functools.partial(_conv_stats_kernel, m_total=m)
    raw, stats = pl.pallas_call(
        kern,
        out_shape=(jax.ShapeDtypeStruct((m, cp), jnp.float32),
                   jax.ShapeDtypeStruct((nt, 2, cp), jnp.float32)),
        grid_spec=pltpu.PrefetchScalarGridSpec(
            num_scalar_prefetch=0,
            grid=(nt,),
            in_specs=[pl.BlockSpec((tm, k), lambda i: (i, 0)),
                      pl.BlockSpec((k, cp), lambda i: (0, 0))],
            out_specs=[pl.BlockSpec((tm, cp), lambda i: (i, 0)),
                       pl.BlockSpec((None, 2, cp), lambda i: (i, 0, 0))]),
        compiler_params=pltpu.CompilerParams(
            dimension_semantics=("parallel",)),
    )(patches, w2d)
    return raw, jnp.sum(stats, axis=0)    # reduce per-tile partials -> (2, Cp)


def batchnorm_scale_bias(stats, m, gamma, beta):
    # training-mode BatchNorm: batch statistics over the M = N*H*W axis
    mean = stats[0] / m
    var = stats[1] / m - mean * mean          # biased variance (PyTorch BN)
    scale = gamma / jnp.sqrt(var + BN_EPS)
    bias = beta - mean * scale
    return scale.reshape(1, -1), bias.reshape(1, -1)


def bn_relu(raw, scale, bias, out_dtype):
    m, cp = raw.shape
    tm = min(TM_EW, m)
    return pl.pallas_call(
        _bn_relu_kernel,
        out_shape=jax.ShapeDtypeStruct((m, cp), out_dtype),
        grid_spec=pltpu.PrefetchScalarGridSpec(
            num_scalar_prefetch=0,
            grid=(pl.cdiv(m, tm),),
            in_specs=[pl.BlockSpec((tm, cp), lambda i: (i, 0)),
                      pl.BlockSpec((1, cp), lambda i: (0, 0)),
                      pl.BlockSpec((1, cp), lambda i: (0, 0))],
            out_specs=pl.BlockSpec((tm, cp), lambda i: (i, 0))),
        compiler_params=pltpu.CompilerParams(
            dimension_semantics=("parallel",)),
    )(raw, scale, bias)


def bn_add_relu(raw, scale, bias, sc_raw, sc_scale, sc_bias):
    m, cp = raw.shape
    tm = min(TM_EW, m)
    return pl.pallas_call(
        _bn_add_relu_kernel,
        out_shape=jax.ShapeDtypeStruct((m, cp), jnp.float32),
        grid_spec=pltpu.PrefetchScalarGridSpec(
            num_scalar_prefetch=0,
            grid=(pl.cdiv(m, tm),),
            in_specs=[pl.BlockSpec((tm, cp), lambda i: (i, 0)),
                      pl.BlockSpec((1, cp), lambda i: (0, 0)),
                      pl.BlockSpec((1, cp), lambda i: (0, 0)),
                      pl.BlockSpec((tm, cp), lambda i: (i, 0)),
                      pl.BlockSpec((1, cp), lambda i: (0, 0)),
                      pl.BlockSpec((1, cp), lambda i: (0, 0))],
            out_specs=pl.BlockSpec((tm, cp), lambda i: (i, 0))),
        compiler_params=pltpu.CompilerParams(
            dimension_semantics=("parallel",)),
    )(raw, scale, bias, sc_raw, sc_scale, sc_bias)


# ----------------------------- JAX glue --------------------------------------

def _round_up(x, m):
    return (x + m - 1) // m * m


def _pad_last(x, target):
    pad = target - x.shape[-1]
    if pad == 0:
        return x
    return jnp.pad(x, [(0, 0)] * (x.ndim - 1) + [(0, pad)])


def im2col_3x3(x_nhwc, stride):
    n, h, w, c = x_nhwc.shape
    ho = (h + 2 - 3) // stride + 1
    wo = (w + 2 - 3) // stride + 1
    xp = jnp.pad(x_nhwc, ((0, 0), (1, 1), (1, 1), (0, 0)))
    cols = []
    for kh in range(3):
        for kw in range(3):
            cols.append(xp[:, kh:kh + (ho - 1) * stride + 1:stride,
                           kw:kw + (wo - 1) * stride + 1:stride, :])
    patches = jnp.concatenate(cols, axis=-1)          # (n, ho, wo, 9*c)
    return patches.reshape(n * ho * wo, 9 * c), (ho, wo)


def res_block_forward(x_nchw, params, stride):
    x_f32 = jnp.transpose(x_nchw, (0, 2, 3, 1)).astype(jnp.float32)   # NHWC
    x_bf16 = x_f32.astype(jnp.bfloat16)
    n, h, w, cin = x_f32.shape
    cout = params["w1"].shape[-1]
    cp = _round_up(cout, LANE)                 # lane-dense channel count

    # lane-padded bf16 weights / f32 BN params (padded gamma/beta are zero, so
    # padded channels stay exactly zero through every stage).
    w1 = _pad_last(params["w1"].reshape(9 * cin, cout), cp).astype(jnp.bfloat16)
    g1 = _pad_last(params["g1"], cp)
    be1 = _pad_last(params["b1"], cp)
    w2 = jnp.pad(params["w2"], ((0, 0), (0, 0), (0, cp - cout), (0, cp - cout)))
    w2 = w2.reshape(9 * cp, cp).astype(jnp.bfloat16)
    g2 = _pad_last(params["g2"], cp)
    be2 = _pad_last(params["b2"], cp)

    # left 1: conv3x3(stride) -> BN -> ReLU   (bf16 handoff to conv2)
    p1, (ho, wo) = im2col_3x3(x_bf16, stride)
    m = n * ho * wo
    raw1, st1 = conv_matmul_with_stats(p1, w1)
    s1, b1 = batchnorm_scale_bias(st1, m, g1, be1)
    y1 = bn_relu(raw1, s1, b1, jnp.bfloat16)                  # (m, cp) bf16

    # shortcut: conv1x1(stride) -> BN, or identity (affine fused downstream)
    if stride != 1 or cin != cout:
        ws = _pad_last(params["ws"], cp).astype(jnp.bfloat16)  # (cin, cp)
        xs = x_bf16[:, ::stride, ::stride, :].reshape(m, cin)
        sc_raw, sts = conv_matmul_with_stats(xs, ws)
        sc_s, sc_b = batchnorm_scale_bias(sts, m,
                                          _pad_last(params["gs"], cp),
                                          _pad_last(params["bs"], cp))
    else:
        sc_raw = _pad_last(x_f32.reshape(m, cout), cp)
        sc_s = jnp.ones((1, cp), jnp.float32)
        sc_b = jnp.zeros((1, cp), jnp.float32)

    # left 2: conv3x3(1), then fused BN2 + shortcut-BN + add + final ReLU
    p2, _ = im2col_3x3(y1.reshape(n, ho, wo, cp), 1)
    raw2, st2 = conv_matmul_with_stats(p2, w2)
    s2, b2 = batchnorm_scale_bias(st2, m, g2, be2)
    out = bn_add_relu(raw2, s2, b2, sc_raw, sc_s, sc_b)       # (m, cp) f32

    out = out[:, :cout].reshape(n, ho, wo, cout)
    return jnp.transpose(out, (0, 3, 1, 2))                   # -> NCHW


# ----------------------------- pure-JAX reference ----------------------------

def ref_forward(x_nchw, params, stride):
    # Mirrors the kernel's numerics: bf16 conv operands, f32 accumulation/BN.
    def conv(x, w_hwio, s, pad):
        return jax.lax.conv_general_dilated(
            x.astype(jnp.bfloat16), w_hwio.astype(jnp.bfloat16),
            (s, s), ((pad, pad), (pad, pad)),
            dimension_numbers=("NCHW", "HWIO", "NCHW"),
            preferred_element_type=jnp.float32)

    def bn(x, gamma, beta):
        mean = jnp.mean(x, axis=(0, 2, 3))
        var = jnp.var(x, axis=(0, 2, 3))              # biased, training-mode BN
        s = gamma / jnp.sqrt(var + BN_EPS)
        b = beta - mean * s
        return x * s[None, :, None, None] + b[None, :, None, None]

    y = conv(x_nchw, params["w1"], stride, 1)
    y = jnp.maximum(bn(y, params["g1"], params["b1"]), 0.0)
    y = y.astype(jnp.bfloat16).astype(jnp.float32)    # mirror bf16 handoff
    y = conv(y, params["w2"], 1, 1)
    y = bn(y, params["g2"], params["b2"])
    if "ws" in params:
        sc = conv(x_nchw, params["ws"].reshape(1, 1, *params["ws"].shape),
                  stride, 0)
        sc = bn(sc, params["gs"], params["bs"])
    else:
        sc = x_nchw.astype(jnp.float32)
    return jnp.maximum(y + sc, 0.0)


# ----------------------------- main -------------------------------------------

def _make_params(key, cin, cout, stride):
    ks = jax.random.split(key, 9)
    params = {
        "w1": jax.random.normal(ks[0], (3, 3, cin, cout), jnp.float32) * 0.1,
        "g1": jax.random.uniform(ks[1], (cout,), jnp.float32, 0.5, 1.5),
        "b1": jax.random.normal(ks[2], (cout,), jnp.float32) * 0.1,
        "w2": jax.random.normal(ks[3], (3, 3, cout, cout), jnp.float32) * 0.1,
        "g2": jax.random.uniform(ks[4], (cout,), jnp.float32, 0.5, 1.5),
        "b2": jax.random.normal(ks[5], (cout,), jnp.float32) * 0.1,
    }
    if stride != 1 or cin != cout:
        params["ws"] = jax.random.normal(ks[6], (cin, cout), jnp.float32) * 0.1
        params["gs"] = jax.random.uniform(ks[7], (cout,), jnp.float32, 0.5, 1.5)
        params["bs"] = jax.random.normal(ks[8], (cout,), jnp.float32) * 0.1
    return params


if __name__ == "__main__":
    root = jax.random.PRNGKey(0)
    cases = [
        # (N, Cin, Cout, H, W, stride)
        (2, 4, 8, 16, 16, 2),   # conv-shortcut path
        (3, 8, 8, 10, 10, 1),   # identity-shortcut path, ragged row tiles
    ]
    for idx, (N, Cin, Cout, H, W, stride) in enumerate(cases):
        kp, kx = jax.random.split(jax.random.fold_in(root, idx))
        params = _make_params(kp, Cin, Cout, stride)
        x = jax.random.normal(kx, (N, Cin, H, W), jnp.float32)

        fwd = jax.jit(functools.partial(res_block_forward, stride=stride))
        out = jax.block_until_ready(fwd(x, params))
        ref = jax.block_until_ready(ref_forward(x, params, stride))

        ho = (H + 2 - 3) // stride + 1
        wo = (W + 2 - 3) // stride + 1
        assert out.shape == (N, Cout, ho, wo), out.shape
        err = float(jnp.max(jnp.abs(out - ref)))
        if err > 2e-2:
            raise AssertionError(
                f"case {idx}: mismatch vs reference, max abs err = {err}")
    print("KERNEL_OK")
</pallas_src>

<mosaic_0001>
module attributes {stable_mosaic.version = 11 : i64} {
  func.func @_conv_stats_kernel(%arg0: i32, %arg1: memref<128x36xbf16, #tpu.memory_space<vmem>>, %arg2: memref<36x128xbf16, #tpu.memory_space<vmem>>, %arg3: memref<128x128xf32, #tpu.memory_space<vmem>>, %arg4: memref<1x2x128xf32, #tpu.memory_space<vmem>>) attributes {dimension_semantics = [#tpu.dimension_semantics<parallel>], iteration_bounds = array<i64: 1>, scalar_prefetch = 0 : i64, scratch_operands = 0 : i64, tpu.core_type = #tpu.core_type<tc>, window_params = [{transform_indices = @transform_0, window_bounds = array<i64: 128, 36>}, {pipeline_mode = #tpu.pipeline_mode<synchronous>, transform_indices = @transform_1, window_bounds = array<i64: 36, 128>}, {transform_indices = @transform_2, window_bounds = array<i64: 128, 128>}, {transform_indices = @transform_3, window_bounds = array<i64: 1, 2, 128>}]} {
    %c0 = arith.constant 0 : index
    %c0_0 = arith.constant 0 : index
    %0 = vector.load %arg1[%c0, %c0_0] : memref<128x36xbf16, #tpu.memory_space<vmem>>, vector<128x36xbf16>
    %c0_1 = arith.constant 0 : index
    %c0_2 = arith.constant 0 : index
    %1 = vector.load %arg2[%c0_1, %c0_2] : memref<36x128xbf16, #tpu.memory_space<vmem>>, vector<36x128xbf16>
    %cst = arith.constant dense<0.000000e+00> : vector<128x128xf32>
    %2 = tpu.matmul %0, %1, %cst {dimension_numbers = #tpu.dot_dimension_numbers<[1], [0], [0], [1], [0, 0, 1, 1], [], []>} : vector<128x36xbf16>, vector<36x128xbf16>, vector<128x128xf32> -> vector<128x128xf32>
    %c0_3 = arith.constant 0 : index
    %c0_4 = arith.constant 0 : index
    %3 = vector.load %arg3[%c0_3, %c0_4] : memref<128x128xf32, #tpu.memory_space<vmem>>, vector<128x128xf32>
    tpu.vector_store %arg3[%c0_3, %c0_4], %2 {strides = array<i32>} : memref<128x128xf32, #tpu.memory_space<vmem>>, vector<128x128xf32>,
    %cst_5 = arith.constant dense<0.000000e+00> : vector<128xf32>
    %4 = vector.multi_reduction <add>, %2, %cst_5 [0] : vector<128x128xf32> to vector<128xf32>
    %5 = vector.shape_cast %4 : vector<128xf32> to vector<1x128xf32>
    %6 = arith.mulf %2, %2 : vector<128x128xf32>
    %cst_6 = arith.constant dense<0.000000e+00> : vector<128xf32>
    %7 = vector.multi_reduction <add>, %6, %cst_6 [0] : vector<128x128xf32> to vector<128xf32>
    %8 = vector.shape_cast %7 : vector<128xf32> to vector<1x128xf32>
    %9 = tpu.concatenate %5, %8 in 0 : vector<1x128xf32>, vector<1x128xf32> -> vector<2x128xf32>
    %c0_7 = arith.constant 0 : index
    %c0_8 = arith.constant 0 : index
    %c0_9 = arith.constant 0 : index
    %10 = vector.load %arg4[%c0_7, %c0_8, %c0_9] : memref<1x2x128xf32, #tpu.memory_space<vmem>>, vector<1x2x128xf32>
    %11 = vector.shape_cast %10 : vector<1x2x128xf32> to vector<2x128xf32>
    %12 = vector.shape_cast %9 : vector<2x128xf32> to vector<1x2x128xf32>
    tpu.vector_store %arg4[%c0_7, %c0_8, %c0_9], %12 {strides = array<i32>} : memref<1x2x128xf32, #tpu.memory_space<vmem>>, vector<1x2x128xf32>,
    return
  }
  func.func @transform_0(%arg0: i32) -> (i32, i32) {
    %c0_i32 = arith.constant 0 : i32
    %c0_i32_0 = arith.constant 0 : i32
    return %arg0, %c0_i32 : i32, i32
  }
  func.func @transform_1(%arg0: i32) -> (i32, i32) {
    %c0_i32 = arith.constant 0 : i32
    %c0_i32_0 = arith.constant 0 : i32
    %c0_i32_1 = arith.constant 0 : i32
    return %c0_i32, %c0_i32_0 : i32, i32
  }
  func.func @transform_2(%arg0: i32) -> (i32, i32) {
    %c0_i32 = arith.constant 0 : i32
    %c0_i32_0 = arith.constant 0 : i32
    return %arg0, %c0_i32 : i32, i32
  }
  func.func @transform_3(%arg0: i32) -> (i32, i32, i32) {
    %c0_i32 = arith.constant 0 : i32
    %c0_i32_0 = arith.constant 0 : i32
    %c0_i32_1 = arith.constant 0 : i32
    return %arg0, %c0_i32, %c0_i32_0 : i32, i32, i32
  }
}

module attributes {stable_mosaic.version = 11 : i64} {
  func.func @_bn_relu_kernel(%arg0: i32, %arg1: memref<128x128xf32, #tpu.memory_space<vmem>>, %arg2: memref<1x128xf32, #tpu.memory_space<vmem>>, %arg3: memref<1x128xf32, #tpu.memory_space<vmem>>, %arg4: memref<128x128xbf16, #tpu.memory_space<vmem>>) attributes {dimension_semantics = [#tpu.dimension_semantics<parallel>], iteration_bounds = array<i64: 1>, scalar_prefetch = 0 : i64, scratch_operands = 0 : i64, tpu.core_type = #tpu.core_type<tc>, window_params = [{transform_indices = @transform_0, window_bounds = array<i64: 128, 128>}, {pipeline_mode = #tpu.pipeline_mode<synchronous>, transform_indices = @transform_1, window_bounds = array<i64: 1, 128>}, {pipeline_mode = #tpu.pipeline_mode<synchronous>, transform_indices = @transform_2, window_bounds = array<i64: 1, 128>}, {transform_indices = @transform_3, window_bounds = array<i64: 128, 128>}]} {
    %c0 = arith.constant 0 : index
    %c0_0 = arith.constant 0 : index
    %0 = vector.load %arg1[%c0, %c0_0] : memref<128x128xf32, #tpu.memory_space<vmem>>, vector<128x128xf32>
    %c0_1 = arith.constant 0 : index
    %c0_2 = arith.constant 0 : index
    %1 = vector.load %arg2[%c0_1, %c0_2] : memref<1x128xf32, #tpu.memory_space<vmem>>, vector<1x128xf32>
    %2 = vector.broadcast %1 : vector<1x128xf32> to vector<128x128xf32>
    %3 = arith.mulf %0, %2 : vector<128x128xf32>
    %c0_3 = arith.constant 0 : index
    %c0_4 = arith.constant 0 : index
    %4 = vector.load %arg3[%c0_3, %c0_4] : memref<1x128xf32, #tpu.memory_space<vmem>>, vector<1x128xf32>
    %5 = vector.broadcast %4 : vector<1x128xf32> to vector<128x128xf32>
    %6 = arith.addf %3, %5 : vector<128x128xf32>
    %cst = arith.constant 0.000000e+00 : f32
    %7 = vector.broadcast %cst : f32 to vector<128x128xf32>
    %8 = arith.maximumf %6, %7 : vector<128x128xf32>
    %9 = arith.truncf %8 : vector<128x128xf32> to vector<128x128xbf16>
    %c0_5 = arith.constant 0 : index
    %c0_6 = arith.constant 0 : index
    %10 = vector.load %arg4[%c0_5, %c0_6] : memref<128x128xbf16, #tpu.memory_space<vmem>>, vector<128x128xbf16>
    tpu.vector_store %arg4[%c0_5, %c0_6], %9 {strides = array<i32>} : memref<128x128xbf16, #tpu.memory_space<vmem>>, vector<128x128xbf16>,
    return
  }
  func.func @transform_0(%arg0: i32) -> (i32, i32) {
    %c0_i32 = arith.constant 0 : i32
    %c0_i32_0 = arith.constant 0 : i32
    return %arg0, %c0_i32 : i32, i32
  }
  func.func @transform_1(%arg0: i32) -> (i32, i32) {
    %c0_i32 = arith.constant 0 : i32
    %c0_i32_0 = arith.constant 0 : i32
    %c0_i32_1 = arith.constant 0 : i32
    return %c0_i32, %c0_i32_0 : i32, i32
  }
  func.func @transform_2(%arg0: i32) -> (i32, i32) {
    %c0_i32 = arith.constant 0 : i32
    %c0_i32_0 = arith.constant 0 : i32
    %c0_i32_1 = arith.constant 0 : i32
    return %c0_i32, %c0_i32_0 : i32, i32
  }
  func.func @transform_3(%arg0: i32) -> (i32, i32) {
    %c0_i32 = arith.constant 0 : i32
    %c0_i32_0 = arith.constant 0 : i32
    return %arg0, %c0_i32 : i32, i32
  }
}

module attributes {stable_mosaic.version = 11 : i64} {
  func.func @_conv_stats_kernel(%arg0: i32, %arg1: memref<128x1152xbf16, #tpu.memory_space<vmem>>, %arg2: memref<1152x128xbf16, #tpu.memory_space<vmem>>, %arg3: memref<128x128xf32, #tpu.memory_space<vmem>>, %arg4: memref<1x2x128xf32, #tpu.memory_space<vmem>>) attributes {dimension_semantics = [#tpu.dimension_semantics<parallel>], iteration_bounds = array<i64: 1>, scalar_prefetch = 0 : i64, scratch_operands = 0 : i64, tpu.core_type = #tpu.core_type<tc>, window_params = [{transform_indices = @transform_0, window_bounds = array<i64: 128, 1152>}, {pipeline_mode = #tpu.pipeline_mode<synchronous>, transform_indices = @transform_1, window_bounds = array<i64: 1152, 128>}, {transform_indices = @transform_2, window_bounds = array<i64: 128, 128>}, {transform_indices = @transform_3, window_bounds = array<i64: 1, 2, 128>}]} {
    %c0 = arith.constant 0 : index
    %c0_0 = arith.constant 0 : index
    %0 = vector.load %arg1[%c0, %c0_0] : memref<128x1152xbf16, #tpu.memory_space<vmem>>, vector<128x1152xbf16>
    %c0_1 = arith.constant 0 : index
    %c0_2 = arith.constant 0 : index
    %1 = vector.load %arg2[%c0_1, %c0_2] : memref<1152x128xbf16, #tpu.memory_space<vmem>>, vector<1152x128xbf16>
    %cst = arith.constant dense<0.000000e+00> : vector<128x128xf32>
    %2 = tpu.matmul %0, %1, %cst {dimension_numbers = #tpu.dot_dimension_numbers<[1], [0], [0], [1], [0, 0, 1, 1], [], []>} : vector<128x1152xbf16>, vector<1152x128xbf16>, vector<128x128xf32> -> vector<128x128xf32>
    %c0_3 = arith.constant 0 : index
    %c0_4 = arith.constant 0 : index
    %3 = vector.load %arg3[%c0_3, %c0_4] : memref<128x128xf32, #tpu.memory_space<vmem>>, vector<128x128xf32>
    tpu.vector_store %arg3[%c0_3, %c0_4], %2 {strides = array<i32>} : memref<128x128xf32, #tpu.memory_space<vmem>>, vector<128x128xf32>,
    %cst_5 = arith.constant dense<0.000000e+00> : vector<128xf32>
    %4 = vector.multi_reduction <add>, %2, %cst_5 [0] : vector<128x128xf32> to vector<128xf32>
    %5 = vector.shape_cast %4 : vector<128xf32> to vector<1x128xf32>
    %6 = arith.mulf %2, %2 : vector<128x128xf32>
    %cst_6 = arith.constant dense<0.000000e+00> : vector<128xf32>
    %7 = vector.multi_reduction <add>, %6, %cst_6 [0] : vector<128x128xf32> to vector<128xf32>
    %8 = vector.shape_cast %7 : vector<128xf32> to vector<1x128xf32>
    %9 = tpu.concatenate %5, %8 in 0 : vector<1x128xf32>, vector<1x128xf32> -> vector<2x128xf32>
    %c0_7 = arith.constant 0 : index
    %c0_8 = arith.constant 0 : index
    %c0_9 = arith.constant 0 : index
    %10 = vector.load %arg4[%c0_7, %c0_8, %c0_9] : memref<1x2x128xf32, #tpu.memory_space<vmem>>, vector<1x2x128xf32>
    %11 = vector.shape_cast %10 : vector<1x2x128xf32> to vector<2x128xf32>
    %12 = vector.shape_cast %9 : vector<2x128xf32> to vector<1x2x128xf32>
    tpu.vector_store %arg4[%c0_7, %c0_8, %c0_9], %12 {strides = array<i32>} : memref<1x2x128xf32, #tpu.memory_space<vmem>>, vector<1x2x128xf32>,
    return
  }
  func.func @transform_0(%arg0: i32) -> (i32, i32) {
    %c0_i32 = arith.constant 0 : i32
    %c0_i32_0 = arith.constant 0 : i32
    return %arg0, %c0_i32 : i32, i32
  }
  func.func @transform_1(%arg0: i32) -> (i32, i32) {
    %c0_i32 = arith.constant 0 : i32
    %c0_i32_0 = arith.constant 0 : i32
    %c0_i32_1 = arith.constant 0 : i32
    return %c0_i32, %c0_i32_0 : i32, i32
  }
  func.func @transform_2(%arg0: i32) -> (i32, i32) {
    %c0_i32 = arith.constant 0 : i32
    %c0_i32_0 = arith.constant 0 : i32
    return %arg0, %c0_i32 : i32, i32
  }
  func.func @transform_3(%arg0: i32) -> (i32, i32, i32) {
    %c0_i32 = arith.constant 0 : i32
    %c0_i32_0 = arith.constant 0 : i32
    %c0_i32_1 = arith.constant 0 : i32
    return %arg0, %c0_i32, %c0_i32_0 : i32, i32, i32
  }
}

module attributes {stable_mosaic.version = 11 : i64} {
  func.func @_conv_stats_kernel(%arg0: i32, %arg1: memref<128x4xbf16, #tpu.memory_space<vmem>>, %arg2: memref<4x128xbf16, #tpu.memory_space<vmem>>, %arg3: memref<128x128xf32, #tpu.memory_space<vmem>>, %arg4: memref<1x2x128xf32, #tpu.memory_space<vmem>>) attributes {dimension_semantics = [#tpu.dimension_semantics<parallel>], iteration_bounds = array<i64: 1>, scalar_prefetch = 0 : i64, scratch_operands = 0 : i64, tpu.core_type = #tpu.core_type<tc>, window_params = [{transform_indices = @transform_0, window_bounds = array<i64: 128, 4>}, {pipeline_mode = #tpu.pipeline_mode<synchronous>, transform_indices = @transform_1, window_bounds = array<i64: 4, 128>}, {transform_indices = @transform_2, window_bounds = array<i64: 128, 128>}, {transform_indices = @transform_3, window_bounds = array<i64: 1, 2, 128>}]} {
    %c0 = arith.constant 0 : index
    %c0_0 = arith.constant 0 : index
    %0 = vector.load %arg1[%c0, %c0_0] : memref<128x4xbf16, #tpu.memory_space<vmem>>, vector<128x4xbf16>
    %c0_1 = arith.constant 0 : index
    %c0_2 = arith.constant 0 : index
    %1 = vector.load %arg2[%c0_1, %c0_2] : memref<4x128xbf16, #tpu.memory_space<vmem>>, vector<4x128xbf16>
    %cst = arith.constant dense<0.000000e+00> : vector<128x128xf32>
    %2 = tpu.matmul %0, %1, %cst {dimension_numbers = #tpu.dot_dimension_numbers<[1], [0], [0], [1], [0, 0, 1, 1], [], []>} : vector<128x4xbf16>, vector<4x128xbf16>, vector<128x128xf32> -> vector<128x128xf32>
    %c0_3 = arith.constant 0 : index
    %c0_4 = arith.constant 0 : index
    %3 = vector.load %arg3[%c0_3, %c0_4] : memref<128x128xf32, #tpu.memory_space<vmem>>, vector<128x128xf32>
    tpu.vector_store %arg3[%c0_3, %c0_4], %2 {strides = array<i32>} : memref<128x128xf32, #tpu.memory_space<vmem>>, vector<128x128xf32>,
    %cst_5 = arith.constant dense<0.000000e+00> : vector<128xf32>
    %4 = vector.multi_reduction <add>, %2, %cst_5 [0] : vector<128x128xf32> to vector<128xf32>
    %5 = vector.shape_cast %4 : vector<128xf32> to vector<1x128xf32>
    %6 = arith.mulf %2, %2 : vector<128x128xf32>
    %cst_6 = arith.constant dense<0.000000e+00> : vector<128xf32>
    %7 = vector.multi_reduction <add>, %6, %cst_6 [0] : vector<128x128xf32> to vector<128xf32>
    %8 = vector.shape_cast %7 : vector<128xf32> to vector<1x128xf32>
    %9 = tpu.concatenate %5, %8 in 0 : vector<1x128xf32>, vector<1x128xf32> -> vector<2x128xf32>
    %c0_7 = arith.constant 0 : index
    %c0_8 = arith.constant 0 : index
    %c0_9 = arith.constant 0 : index
    %10 = vector.load %arg4[%c0_7, %c0_8, %c0_9] : memref<1x2x128xf32, #tpu.memory_space<vmem>>, vector<1x2x128xf32>
    %11 = vector.shape_cast %10 : vector<1x2x128xf32> to vector<2x128xf32>
    %12 = vector.shape_cast %9 : vector<2x128xf32> to vector<1x2x128xf32>
    tpu.vector_store %arg4[%c0_7, %c0_8, %c0_9], %12 {strides = array<i32>} : memref<1x2x128xf32, #tpu.memory_space<vmem>>, vector<1x2x128xf32>,
    return
  }
  func.func @transform_0(%arg0: i32) -> (i32, i32) {
    %c0_i32 = arith.constant 0 : i32
    %c0_i32_0 = arith.constant 0 : i32
    return %arg0, %c0_i32 : i32, i32
  }
  func.func @transform_1(%arg0: i32) -> (i32, i32) {
    %c0_i32 = arith.constant 0 : i32
    %c0_i32_0 = arith.constant 0 : i32
    %c0_i32_1 = arith.constant 0 : i32
    return %c0_i32, %c0_i32_0 : i32, i32
  }
  func.func @transform_2(%arg0: i32) -> (i32, i32) {
    %c0_i32 = arith.constant 0 : i32
    %c0_i32_0 = arith.constant 0 : i32
    return %arg0, %c0_i32 : i32, i32
  }
  func.func @transform_3(%arg0: i32) -> (i32, i32, i32) {
    %c0_i32 = arith.constant 0 : i32
    %c0_i32_0 = arith.constant 0 : i32
    %c0_i32_1 = arith.constant 0 : i32
    return %arg0, %c0_i32, %c0_i32_0 : i32, i32, i32
  }
}

module attributes {stable_mosaic.version = 11 : i64} {
  func.func @_bn_add_relu_kernel(%arg0: i32, %arg1: memref<128x128xf32, #tpu.memory_space<vmem>>, %arg2: memref<1x128xf32, #tpu.memory_space<vmem>>, %arg3: memref<1x128xf32, #tpu.memory_space<vmem>>, %arg4: memref<128x128xf32, #tpu.memory_space<vmem>>, %arg5: memref<1x128xf32, #tpu.memory_space<vmem>>, %arg6: memref<1x128xf32, #tpu.memory_space<vmem>>, %arg7: memref<128x128xf32, #tpu.memory_space<vmem>>) attributes {dimension_semantics = [#tpu.dimension_semantics<parallel>], iteration_bounds = array<i64: 1>, scalar_prefetch = 0 : i64, scratch_operands = 0 : i64, tpu.core_type = #tpu.core_type<tc>, window_params = [{transform_indices = @transform_0, window_bounds = array<i64: 128, 128>}, {pipeline_mode = #tpu.pipeline_mode<synchronous>, transform_indices = @transform_1, window_bounds = array<i64: 1, 128>}, {pipeline_mode = #tpu.pipeline_mode<synchronous>, transform_indices = @transform_2, window_bounds = array<i64: 1, 128>}, {transform_indices = @transform_3, window_bounds = array<i64: 128, 128>}, {pipeline_mode = #tpu.pipeline_mode<synchronous>, transform_indices = @transform_4, window_bounds = array<i64: 1, 128>}, {pipeline_mode = #tpu.pipeline_mode<synchronous>, transform_indices = @transform_5, window_bounds = array<i64: 1, 128>}, {transform_indices = @transform_6, window_bounds = array<i64: 128, 128>}]} {
    %c0 = arith.constant 0 : index
    %c0_0 = arith.constant 0 : index
    %0 = vector.load %arg1[%c0, %c0_0] : memref<128x128xf32, #tpu.memory_space<vmem>>, vector<128x128xf32>
    %c0_1 = arith.constant 0 : index
    %c0_2 = arith.constant 0 : index
    %1 = vector.load %arg2[%c0_1, %c0_2] : memref<1x128xf32, #tpu.memory_space<vmem>>, vector<1x128xf32>
    %2 = vector.broadcast %1 : vector<1x128xf32> to vector<128x128xf32>
    %3 = arith.mulf %0, %2 : vector<128x128xf32>
    %c0_3 = arith.constant 0 : index
    %c0_4 = arith.constant 0 : index
    %4 = vector.load %arg3[%c0_3, %c0_4] : memref<1x128xf32, #tpu.memory_space<vmem>>, vector<1x128xf32>
    %5 = vector.broadcast %4 : vector<1x128xf32> to vector<128x128xf32>
    %6 = arith.addf %3, %5 : vector<128x128xf32>
    %c0_5 = arith.constant 0 : index
    %c0_6 = arith.constant 0 : index
    %7 = vector.load %arg4[%c0_5, %c0_6] : memref<128x128xf32, #tpu.memory_space<vmem>>, vector<128x128xf32>
    %c0_7 = arith.constant 0 : index
    %c0_8 = arith.constant 0 : index
    %8 = vector.load %arg5[%c0_7, %c0_8] : memref<1x128xf32, #tpu.memory_space<vmem>>, vector<1x128xf32>
    %9 = vector.broadcast %8 : vector<1x128xf32> to vector<128x128xf32>
    %10 = arith.mulf %7, %9 : vector<128x128xf32>
    %11 = arith.addf %6, %10 : vector<128x128xf32>
    %c0_9 = arith.constant 0 : index
    %c0_10 = arith.constant 0 : index
    %12 = vector.load %arg6[%c0_9, %c0_10] : memref<1x128xf32, #tpu.memory_space<vmem>>, vector<1x128xf32>
    %13 = vector.broadcast %12 : vector<1x128xf32> to vector<128x128xf32>
    %14 = arith.addf %11, %13 : vector<128x128xf32>
    %cst = arith.constant 0.000000e+00 : f32
    %15 = vector.broadcast %cst : f32 to vector<128x128xf32>
    %16 = arith.maximumf %14, %15 : vector<128x128xf32>
    %c0_11 = arith.constant 0 : index
    %c0_12 = arith.constant 0 : index
    %17 = vector.load %arg7[%c0_11, %c0_12] : memref<128x128xf32, #tpu.memory_space<vmem>>, vector<128x128xf32>
    tpu.vector_store %arg7[%c0_11, %c0_12], %16 {strides = array<i32>} : memref<128x128xf32, #tpu.memory_space<vmem>>, vector<128x128xf32>,
    return
  }
  func.func @transform_0(%arg0: i32) -> (i32, i32) {
    %c0_i32 = arith.constant 0 : i32
    %c0_i32_0 = arith.constant 0 : i32
    return %arg0, %c0_i32 : i32, i32
  }
  func.func @transform_1(%arg0: i32) -> (i32, i32) {
    %c0_i32 = arith.constant 0 : i32
    %c0_i32_0 = arith.constant 0 : i32
    %c0_i32_1 = arith.constant 0 : i32
    return %c0_i32, %c0_i32_0 : i32, i32
  }
  func.func @transform_2(%arg0: i32) -> (i32, i32) {
    %c0_i32 = arith.constant 0 : i32
    %c0_i32_0 = arith.constant 0 : i32
    %c0_i32_1 = arith.constant 0 : i32
    return %c0_i32, %c0_i32_0 : i32, i32
  }
  func.func @transform_3(%arg0: i32) -> (i32, i32) {
    %c0_i32 = arith.constant 0 : i32
    %c0_i32_0 = arith.constant 0 : i32
    return %arg0, %c0_i32 : i32, i32
  }
  func.func @transform_4(%arg0: i32) -> (i32, i32) {
    %c0_i32 = arith.constant 0 : i32
    %c0_i32_0 = arith.constant 0 : i32
    %c0_i32_1 = arith.constant 0 : i32
    return %c0_i32, %c0_i32_0 : i32, i32
  }
  func.func @transform_5(%arg0: i32) -> (i32, i32) {
    %c0_i32 = arith.constant 0 : i32
    %c0_i32_0 = arith.constant 0 : i32
    %c0_i32_1 = arith.constant 0 : i32
    return %c0_i32, %c0_i32_0 : i32, i32
  }
  func.func @transform_6(%arg0: i32) -> (i32, i32) {
    %c0_i32 = arith.constant 0 : i32
    %c0_i32_0 = arith.constant 0 : i32
    return %arg0, %c0_i32 : i32, i32
  }
}

</mosaic_0001>

<bundles_post_ra>
// kernel: res_block_forward.6
= control target key start
LH: loop header
LB: loop body
LE: loop exit
PB: predicated region body
PF: predicated region fallthrough
CT: control target
= control target key end

     0   :  { %s287_s0 = inlined_call_operand.vmem [shape: f32[128,128], index: 0, kind: input, shape index: {}]   ;;  %s288_s1 = inlined_call_operand.vmem [shape: f32[1,128], index: 1, kind: input, shape index: {}]   ;;  %s289_s2 = inlined_call_operand.vmem [shape: f32[1,128], index: 2, kind: input, shape index: {}]   ;;  %s290_s3 = inlined_call_operand.vmem [shape: bf16[128,128], index: 3, kind: output, shape index: {}]  }
   0x1   :  { %v14_v0 = vld [vmem:[%s287_s0] sm:$0xff]  ;;  %v15_v1 = vld [vmem:[%s287_s0 + $0x8] sm:$0xff]  ;;  %v16_v4 = vld [vmem:[%s287_s0 + $0x10] sm:$0xff] }
   0x2   :  { %v169_v2 = vld [vmem:[%s288_s1] ss:$0 sm:$0xff]  ;;  %v17_v5 = vld [vmem:[%s287_s0 + $0x18] sm:$0xff]  ;;  %v19_v11 = vld [vmem:[%s287_s0 + $0x28] sm:$0xff] }
   0x3   :  { %v203_v3 = vld [vmem:[%s289_s2] ss:$0 sm:$0xff]  ;;  %v34_v7 = vmul.f32 %v169_v2, %v14_v0  ;;  %v35_v8 = vmul.f32 %v169_v2, %v15_v1  ;;  %v36_v9 = vmul.f32 %v169_v2, %v16_v4  ;;  %v37_v10 = vmul.f32 %v169_v2, %v17_v5  ;;  %v20_v12 = vld [vmem:[%s287_s0 + $0x30] sm:$0xff]  ;;  %v21_v13 = vld [vmem:[%s287_s0 + $0x38] sm:$0xff] }
   0x4   :  { %v18_v6 = vld [vmem:[%s287_s0 + $0x20] sm:$0xff]  ;;  %v39_v15 = vmul.f32 %v169_v2, %v19_v11  ;;  %v40_v16 = vmul.f32 %v169_v2, %v20_v12  ;;  %v41_v17 = vmul.f32 %v169_v2, %v21_v13  ;;  %v23_v27 = vld [vmem:[%s287_s0 + $0x48] sm:$0xff]  ;;  %v24_v32 = vld [vmem:[%s287_s0 + $0x50] sm:$0xff] }
   0x5   :  { %v38_v14 = vmul.f32 %v169_v2, %v18_v6  ;;  %v54_v18 = vadd.f32 %v203_v3, %v34_v7  ;;  %v55_v19 = vadd.f32 %v203_v3, %v35_v8  ;;  %v56_v20 = vadd.f32 %v203_v3, %v36_v9  ;;  %v22_v26 = vld [vmem:[%s287_s0 + $0x40] sm:$0xff]  ;;  %v25_v33 = vld [vmem:[%s287_s0 + $0x58] sm:$0xff]  ;;  %v27_v39 = vld [vmem:[%s287_s0 + $0x68] sm:$0xff] }
   0x6   :  { %v57_v21 = vadd.f32 %v203_v3, %v37_v10  ;;  %v59_v23 = vadd.f32 %v203_v3, %v39_v15  ;;  %v60_v24 = vadd.f32 %v203_v3, %v40_v16  ;;  %v61_v25 = vadd.f32 %v203_v3, %v41_v17  ;;  %v26_v38 = vld [vmem:[%s287_s0 + $0x60] sm:$0xff]  ;;  %v28_v44 = vld [vmem:[%s287_s0 + $0x70] sm:$0xff]  ;;  %v29_v45 = vld [vmem:[%s287_s0 + $0x78] sm:$0xff] }
   0x7   :  { %v58_v22 = vadd.f32 %v203_v3, %v38_v14  ;;  %v70_v28 = vmax.f32 %v54_v18, 0.0  ;;  %v71_v29 = vmax.f32 %v55_v19, 0.0  ;;  %v72_v30 = vmax.f32 %v56_v20, 0.0 }
   0x8   :  { %v73_v31 = vmax.f32 %v57_v21, 0.0  ;;  %v75_v35 = vmax.f32 %v59_v23, 0.0  ;;  %v76_v36 = vmax.f32 %v60_v24, 0.0  ;;  %v77_v37 = vmax.f32 %v61_v25, 0.0 }
   0x9   :  { %v74_v34 = vmax.f32 %v58_v22, 0.0  ;;  %v125_v40 = vpack.c.bf16 %v71_v29, %v70_v28  ;;  %v42_v42 = vmul.f32 %v169_v2, %v22_v26  ;;  %v43_v43 = vmul.f32 %v169_v2, %v23_v27 }
   0xa   :  { %v130_v41 = vpack.c.bf16 %v73_v31, %v72_v30  ;;  %v140_v47 = vpack.c.bf16 %v77_v37, %v76_v36  ;;  %v44_v48 = vmul.f32 %v169_v2, %v24_v32  ;;  %v45_v49 = vmul.f32 %v169_v2, %v25_v33 }
   0xb   :  { %v135_v46 = vpack.c.bf16 %v75_v35, %v74_v34  ;;  %126 = vst [vmem:[%s290_s3] sm:$0xff] %v125_v40   ;;  %v62_v50 = vadd.f32 %v203_v3, %v42_v42  ;;  %v63_v51 = vadd.f32 %v203_v3, %v43_v43  ;;  %v46_v52 = vmul.f32 %v169_v2, %v26_v38 }
   0xc   :  { %v47_v53 = vmul.f32 %v169_v2, %v27_v39  ;;  %162 = vst [vmem:[%s290_s3 + $0x8] sm:$0xff] %v130_v41   ;;  %v64_v54 = vadd.f32 %v203_v3, %v44_v48  ;;  %v65_v55 = vadd.f32 %v203_v3, %v45_v49  ;;  %v48_v56 = vmul.f32 %v169_v2, %v28_v44 }
   0xd   :  { %v49_v57 = vmul.f32 %v169_v2, %v29_v45  ;;  %163 = vst [vmem:[%s290_s3 + $0x10] sm:$0xff] %v135_v46   ;;  %v78_v58 = vmax.f32 %v62_v50, 0.0  ;;  %v79_v59 = vmax.f32 %v63_v51, 0.0  ;;  %v66_v60 = vadd.f32 %v203_v3, %v46_v52 }
   0xe   :  { %v67_v61 = vadd.f32 %v203_v3, %v47_v53  ;;  %164 = vst [vmem:[%s290_s3 + $0x18] sm:$0xff] %v140_v47   ;;  %v80_v62 = vmax.f32 %v64_v54, 0.0  ;;  %v81_v63 = vmax.f32 %v65_v55, 0.0  ;;  %v68_v0 = vadd.f32 %v203_v3, %v48_v56 }
   0xf   :  { %v69_v1 = vadd.f32 %v203_v3, %v49_v57  ;;  %v145_v2 = vpack.c.bf16 %v79_v59, %v78_v58  ;;  %v82_v4 = vmax.f32 %v66_v60, 0.0 }
  0x10   :  { %v83_v5 = vmax.f32 %v67_v61, 0.0  ;;  %v150_v6 = vpack.c.bf16 %v81_v63, %v80_v62  ;;  %v84_v7 = vmax.f32 %v68_v0, 0.0 }
  0x11   :  { %v85_v8 = vmax.f32 %v69_v1, 0.0  ;;  %165 = vst [vmem:[%s290_s3 + $0x20] sm:$0xff] %v145_v2  }
  0x12   :  { %v155_v9 = vpack.c.bf16 %v83_v5, %v82_v4  ;;  %166 = vst [vmem:[%s290_s3 + $0x28] sm:$0xff] %v150_v6  }
  0x13   :  { %v160_v10 = vpack.c.bf16 %v85_v8, %v84_v7 }
  0x14   :  { %167 = vst [vmem:[%s290_s3 + $0x30] sm:$0xff] %v155_v9  }
  0x15   :  { %168 = vst [vmem:[%s290_s3 + $0x38] sm:$0xff] %v160_v10  }

// kernel: res_block_forward.5
= control target key start
LH: loop header
LB: loop body
LE: loop exit
PB: predicated region body
PF: predicated region fallthrough
CT: control target
= control target key end

     0   :  { %vm115_vm0 = vcmask 1041408   ;;  %vm90_vm1 = vcmask 293888   ;;  %vm242_vm2 = vcmask 1040384   ;;  %s432_s1 = inlined_call_operand.vmem [shape: bf16[36,128], index: 1, kind: input, shape index: {}]   ;;  %s433_s0 = inlined_call_operand.vmem [shape: bf16[128,36], index: 0, kind: input, shape index: {}]   ;;  %s434_s2 = inlined_call_operand.vmem [shape: f32[128,128], index: 2, kind: output, shape index: {0}]   ;;  %s435_s3 = inlined_call_operand.vmem [shape: f32[1,2,128], index: 3, kind: output, shape index: {1}]  }
   0x1   :  { %v34_v0 = vld [vmem:[%s432_s1 + $0x10] sm:$0x3]  ;;  %v310_v4 = vld [vmem:[%s432_s1 + $0x8] sm:$0xff]  ;;  %v309_v5 = vld [vmem:[%s432_s1] sm:$0xff] }
   0x2   :  { %v84_v1 = vunpack.c.l.b16 %v34_v0  ;;  %v301_v6 = vld [vmem:[%s433_s0] sm:$0xff]  ;;  %v303_v7 = vld [vmem:[%s433_s0 + $0x10] sm:$0xff]  ;;  %v302_v10 = vld [vmem:[%s433_s0 + $0x8] sm:$0xff] }
   0x3   :  { %v305_v8 = vld [vmem:[%s433_s0 + $0x20] sm:$0xff]  ;;  %v307_v9 = vld [vmem:[%s433_s0 + $0x30] sm:$0xff]  ;;  %v304_v11 = vld [vmem:[%s433_s0 + $0x18] sm:$0xff] }
   0x4   :  { %v87_v2 = vpack.c.b16 %v84_v1, %v84_v1  ;;  %v306_v12 = vld [vmem:[%s433_s0 + $0x28] sm:$0xff]  ;;  %v308_v13 = vld [vmem:[%s433_s0 + $0x38] sm:$0xff] }
   0x6   :  { %v117_v3 = vsel %vm115_vm0, %v87_v2, 0 }
   0x7   :  { %124 = vmatpush.bf16.msra.mxu0 %v117_v3  ;;  %311 = vmatpush.bf16.msra.mxu1 %v117_v3 }
   0x8   :  { %312 = vmatpush.bf16.msra.mxu2 %v117_v3  ;;  %313 = vmatpush.bf16.msra.mxu3 %v117_v3 }
   0xb   :  { %125 = vmatpush.bf16.msra.mxu0 %v310_v4  ;;  %314 = vmatpush.bf16.msra.mxu1 %v310_v4 }
   0xc   :  { %315 = vmatpush.bf16.msra.mxu2 %v310_v4  ;;  %316 = vmatpush.bf16.msra.mxu3 %v310_v4 }
   0xf   :  { %126 = vmatpush.bf16.msra.mxu0 %v309_v5  ;;  %317 = vmatpush.bf16.msra.mxu1 %v309_v5 }
  0x10   :  { %318 = vmatpush.bf16.msra.mxu2 %v309_v5  ;;  %319 = vmatpush.bf16.msra.mxu3 %v309_v5 }
  0x12   :  { %293 = vmatmul.msk.bf16.vlgmr.msra.gmra.mxu0 %vm90_vm1, %v301_v6  ;;  %295 = vmatmul.msk.bf16.vlgmr.msra.gmra.mxu1 %vm90_vm1, %v303_v7 }
  0x13   :  { %297 = vmatmul.msk.bf16.vlgmr.msra.gmra.mxu2 %vm90_vm1, %v305_v8  ;;  %299 = vmatmul.msk.bf16.vlgmr.msra.gmra.mxu3 %vm90_vm1, %v307_v9 }
  0x22   :  { %294 = vmatmul.msk.bf16.gmra.mxu0 %vm90_vm1, %v302_v10  ;;  %296 = vmatmul.msk.bf16.gmra.mxu1 %vm90_vm1, %v304_v11 }
  0x23   :  { %298 = vmatmul.msk.bf16.gmra.mxu2 %vm90_vm1, %v306_v12  ;;  %300 = vmatmul.msk.bf16.gmra.mxu3 %vm90_vm1, %v308_v13 }
  0x8f   :  { %v128_v14 = vpop.f32.mrf.mxu0  ;;  %v138_v15 = vpop.f32.mrf.mxu1 }
  0x90   :  { %168 = vst [vmem:[%s434_s2] sm:$0xff] %v128_v14  ;;  %v205_v25 = vmul.f32 %v128_v14, %v128_v14  ;;  %v209_v37 = vmul.f32 %v138_v15, %v138_v15 }
  0x91   :  { %172 = vst [vmem:[%s434_s2 + $0x20] sm:$0xff] %v138_v15 }
  0x96   :  { %v148_v16 = vpop.f32.mrf.mxu2  ;;  %v158_v17 = vpop.f32.mrf.mxu3 }
  0x97   :  { %v130_v18 = vpop.f32.mrf.mxu0  ;;  %v140_v19 = vpop.f32.mrf.mxu1  ;;  %176 = vst [vmem:[%s434_s2 + $0x40] sm:$0xff] %v148_v16  ;;  %v213_v51 = vmul.f32 %v148_v16, %v148_v16  ;;  %v217_v63 = vmul.f32 %v158_v17, %v158_v17 }
  0x98   :  { %169 = vst [vmem:[%s434_s2 + $0x8] sm:$0xff] %v130_v18  ;;  %v206_v24 = vmul.f32 %v130_v18, %v130_v18  ;;  %v184_v26 = vadd.f32 %v130_v18, %v128_v14  ;;  %v210_v40 = vmul.f32 %v140_v19, %v140_v19 }
  0x99   :  { %173 = vst [vmem:[%s434_s2 + $0x28] sm:$0xff] %v140_v19 }
  0x9a   :  { %180 = vst [vmem:[%s434_s2 + $0x60] sm:$0xff] %v158_v17  ;;  %v221_v28 = vadd.f32 %v206_v24, %v205_v25 }
  0x9e   :  { %v150_v20 = vpop.f32.mrf.mxu2  ;;  %v160_v21 = vpop.f32.mrf.mxu3 }
  0x9f   :  { %v133_v22 = vpop.f32.mrf.mxu0  ;;  %v143_v23 = vpop.f32.mrf.mxu1  ;;  %177 = vst [vmem:[%s434_s2 + $0x48] sm:$0xff] %v150_v20  ;;  %v214_v54 = vmul.f32 %v150_v20, %v150_v20  ;;  %v218_v2 = vmul.f32 %v160_v21, %v160_v21 }
  0xa0   :  { %170 = vst [vmem:[%s434_s2 + $0x10] sm:$0xff] %v133_v22  ;;  %v207_v27 = vmul.f32 %v133_v22, %v133_v22  ;;  %v185_v29 = vadd.f32 %v184_v26, %v133_v22  ;;  %v211_v43 = vmul.f32 %v143_v23, %v143_v23 }
  0xa1   :  { %174 = vst [vmem:[%s434_s2 + $0x30] sm:$0xff] %v143_v23 }
  0xa2   :  { %181 = vst [vmem:[%s434_s2 + $0x68] sm:$0xff] %v160_v21  ;;  %v222_v34 = vadd.f32 %v221_v28, %v207_v27 }
  0xa6   :  { %v153_v30 = vpop.f32.mrf.mxu2  ;;  %v163_v31 = vpop.f32.mrf.mxu3 }
  0xa7   :  { %v135_v32 = vpop.f32.mrf.mxu0  ;;  %v145_v33 = vpop.f32.mrf.mxu1  ;;  %178 = vst [vmem:[%s434_s2 + $0x50] sm:$0xff] %v153_v30  ;;  %v215_v58 = vmul.f32 %v153_v30, %v153_v30  ;;  %v219_v6 = vmul.f32 %v163_v31, %v163_v31 }
  0xa8   :  { %171 = vst [vmem:[%s434_s2 + $0x18] sm:$0xff] %v135_v32  ;;  %v186_v35 = vadd.f32 %v185_v29, %v135_v32  ;;  %v208_v36 = vmul.f32 %v135_v32, %v135_v32  ;;  %v212_v49 = vmul.f32 %v145_v33, %v145_v33 }
  0xa9   :  { %175 = vst [vmem:[%s434_s2 + $0x38] sm:$0xff] %v145_v33 }
  0xaa   :  { %v187_v38 = vadd.f32 %v186_v35, %v138_v15  ;;  %v223_v39 = vadd.f32 %v222_v34, %v208_v36  ;;  %182 = vst [vmem:[%s434_s2 + $0x70] sm:$0xff] %v163_v31 }
  0xac   :  { %v224_v41 = vadd.f32 %v223_v39, %v209_v37  ;;  %v188_v42 = vadd.f32 %v187_v38, %v140_v19 }
  0xae   :  { %v189_v44 = vadd.f32 %v188_v42, %v143_v23  ;;  %v225_v45 = vadd.f32 %v224_v41, %v210_v40  ;;  %v155_v46 = vpop.f32.mrf.mxu2  ;;  %v165_v47 = vpop.f32.mrf.mxu3 }
  0xaf   :  { %179 = vst [vmem:[%s434_s2 + $0x58] sm:$0xff] %v155_v46  ;;  %v216_v62 = vmul.f32 %v155_v46, %v155_v46  ;;  %v220_v10 = vmul.f32 %v165_v47, %v165_v47 }
  0xb0   :  { %v190_v48 = vadd.f32 %v189_v44, %v145_v33  ;;  %v226_v50 = vadd.f32 %v225_v45, %v211_v43  ;;  %183 = vst [vmem:[%s434_s2 + $0x78] sm:$0xff] %v165_v47 }
  0xb2   :  { %v191_v52 = vadd.f32 %v190_v48, %v148_v16  ;;  %v227_v53 = vadd.f32 %v226_v50, %v212_v49 }
  0xb4   :  { %v228_v55 = vadd.f32 %v227_v53, %v213_v51  ;;  %v192_v56 = vadd.f32 %v191_v52, %v150_v20 }
  0xb6   :  { %v193_v57 = vadd.f32 %v192_v56, %v153_v30  ;;  %v229_v59 = vadd.f32 %v228_v55, %v214_v54 }
  0xb8   :  { %v230_v60 = vadd.f32 %v229_v59, %v215_v58  ;;  %v194_v61 = vadd.f32 %v193_v57, %v155_v46 }
  0xba   :  { %v195_v0 = vadd.f32 %v194_v61, %v158_v17  ;;  %v231_v1 = vadd.f32 %v230_v60, %v216_v62 }
  0xbc   :  { %v232_v3 = vadd.f32 %v231_v1, %v217_v63  ;;  %v196_v4 = vadd.f32 %v195_v0, %v160_v21 }
  0xbe   :  { %v197_v5 = vadd.f32 %v196_v4, %v163_v31  ;;  %v233_v7 = vadd.f32 %v232_v3, %v218_v2 }
  0xc0   :  { %v234_v8 = vadd.f32 %v233_v7, %v219_v6  ;;  %v198_v9 = vadd.f32 %v197_v5, %v165_v47 }
  0xc2   :  { %v199_v11 = vrot.slane %v198_v9, 4  ;;  %v235_v12 = vadd.f32 %v234_v8, %v220_v10 }
  0xc4   :  { %v200_v13 = vadd.f32 %v199_v11, %v198_v9  ;;  %v236_v14 = vrot.slane %v235_v12, 4 }
  0xc6   :  { %v201_v15 = vrot.slane %v200_v13, 2  ;;  %v237_v16 = vadd.f32 %v236_v14, %v235_v12 }
  0xc8   :  { %v202_v18 = vadd.f32 %v201_v15, %v200_v13  ;;  %v238_v19 = vrot.slane %v237_v16, 2 }
  0xca   :  { %v203_v20 = vrot.slane %v202_v18, 1  ;;  %v239_v17 = vadd.f32 %v238_v19, %v237_v16 }
  0xcc   :  { %v240_v22 = vrot.slane %v239_v17, 1  ;;  %v204_v23 = vadd.f32 %v203_v20, %v202_v18 }
  0xce   :  { %v241_v21 = vadd.f32 %v240_v22, %v239_v17 }
  0xd0   :  { %v243_v24 = vsel %vm242_vm2, %v204_v23, %v241_v21 }
  0xd1   :  { %244 = vst [vmem:[%s435_s3] sm:$0x3] %v243_v24 }

// kernel: res_block_forward.7
= control target key start
LH: loop header
LB: loop body
LE: loop exit
PB: predicated region body
PF: predicated region fallthrough
CT: control target
= control target key end

     0   :  { %vm96_vm0 = vcmask 1041408   ;;  %vm71_vm1 = vcmask 31744   ;;  %vm223_vm2 = vcmask 1040384   ;;  %s391_s1 = inlined_call_operand.vmem [shape: bf16[4,128], index: 1, kind: input, shape index: {}]   ;;  %s392_s0 = inlined_call_operand.vmem [shape: bf16[128,4], index: 0, kind: input, shape index: {}]   ;;  %s393_s2 = inlined_call_operand.vmem [shape: f32[128,128], index: 2, kind: output, shape index: {0}]   ;;  %s394_s3 = inlined_call_operand.vmem [shape: f32[1,2,128], index: 3, kind: output, shape index: {1}]  }
   0x1   :  { %v30_v0 = vld [vmem:[%s391_s1] sm:$0x3]  ;;  %v276_v3 = vld [vmem:[%s392_s0 + $0x10] sm:$0xff]  ;;  %v275_v6 = vld [vmem:[%s392_s0 + $0x8] sm:$0xff] }
   0x2   :  { %v98_v1 = vsel %vm96_vm0, %v30_v0, 0  ;;  %v274_v2 = vld [vmem:[%s392_s0] sm:$0xff]  ;;  %v280_v5 = vld [vmem:[%s392_s0 + $0x30] sm:$0xff]  ;;  %v277_v7 = vld [vmem:[%s392_s0 + $0x18] sm:$0xff] }
   0x3   :  { %107 = vmatpush.bf16.msra.mxu0 %v98_v1  ;;  %282 = vmatpush.bf16.msra.mxu1 %v98_v1  ;;  %v278_v4 = vld [vmem:[%s392_s0 + $0x20] sm:$0xff]  ;;  %v279_v8 = vld [vmem:[%s392_s0 + $0x28] sm:$0xff]  ;;  %v281_v9 = vld [vmem:[%s392_s0 + $0x38] sm:$0xff] }
   0x4   :  { %283 = vmatpush.bf16.msra.mxu2 %v98_v1  ;;  %284 = vmatpush.bf16.msra.mxu3 %v98_v1 }
   0x6   :  { %266 = vmatmul.msk.bf16.vlgmr.msra.gmra.mxu0 %vm71_vm1, %v274_v2  ;;  %268 = vmatmul.msk.bf16.vlgmr.msra.gmra.mxu1 %vm71_vm1, %v276_v3 }
   0x7   :  { %270 = vmatmul.msk.bf16.vlgmr.msra.gmra.mxu2 %vm71_vm1, %v278_v4  ;;  %272 = vmatmul.msk.bf16.vlgmr.msra.gmra.mxu3 %vm71_vm1, %v280_v5 }
  0x16   :  { %267 = vmatmul.msk.bf16.gmra.mxu0 %vm71_vm1, %v275_v6  ;;  %269 = vmatmul.msk.bf16.gmra.mxu1 %vm71_vm1, %v277_v7 }
  0x17   :  { %271 = vmatmul.msk.bf16.gmra.mxu2 %vm71_vm1, %v279_v8  ;;  %273 = vmatmul.msk.bf16.gmra.mxu3 %vm71_vm1, %v281_v9 }
  0x83   :  { %v109_v10 = vpop.f32.mrf.mxu0  ;;  %v119_v11 = vpop.f32.mrf.mxu1 }
  0x84   :  { %149 = vst [vmem:[%s393_s2] sm:$0xff] %v109_v10  ;;  %v186_v21 = vmul.f32 %v109_v10, %v109_v10  ;;  %v190_v33 = vmul.f32 %v119_v11, %v119_v11 }
  0x85   :  { %153 = vst [vmem:[%s393_s2 + $0x20] sm:$0xff] %v119_v11 }
  0x8a   :  { %v129_v12 = vpop.f32.mrf.mxu2  ;;  %v139_v13 = vpop.f32.mrf.mxu3 }
  0x8b   :  { %v111_v14 = vpop.f32.mrf.mxu0  ;;  %v121_v15 = vpop.f32.mrf.mxu1  ;;  %157 = vst [vmem:[%s393_s2 + $0x40] sm:$0xff] %v129_v12  ;;  %v194_v47 = vmul.f32 %v129_v12, %v129_v12  ;;  %v198_v59 = vmul.f32 %v139_v13, %v139_v13 }
  0x8c   :  { %150 = vst [vmem:[%s393_s2 + $0x8] sm:$0xff] %v111_v14  ;;  %v187_v20 = vmul.f32 %v111_v14, %v111_v14  ;;  %v165_v22 = vadd.f32 %v111_v14, %v109_v10  ;;  %v191_v36 = vmul.f32 %v121_v15, %v121_v15 }
  0x8d   :  { %154 = vst [vmem:[%s393_s2 + $0x28] sm:$0xff] %v121_v15 }
  0x8e   :  { %161 = vst [vmem:[%s393_s2 + $0x60] sm:$0xff] %v139_v13  ;;  %v202_v24 = vadd.f32 %v187_v20, %v186_v21 }
  0x92   :  { %v131_v16 = vpop.f32.mrf.mxu2  ;;  %v141_v17 = vpop.f32.mrf.mxu3 }
  0x93   :  { %v114_v18 = vpop.f32.mrf.mxu0  ;;  %v124_v19 = vpop.f32.mrf.mxu1  ;;  %158 = vst [vmem:[%s393_s2 + $0x48] sm:$0xff] %v131_v16  ;;  %v195_v50 = vmul.f32 %v131_v16, %v131_v16  ;;  %v199_v62 = vmul.f32 %v141_v17, %v141_v17 }
  0x94   :  { %151 = vst [vmem:[%s393_s2 + $0x10] sm:$0xff] %v114_v18  ;;  %v188_v23 = vmul.f32 %v114_v18, %v114_v18  ;;  %v166_v25 = vadd.f32 %v165_v22, %v114_v18  ;;  %v192_v39 = vmul.f32 %v124_v19, %v124_v19 }
  0x95   :  { %155 = vst [vmem:[%s393_s2 + $0x30] sm:$0xff] %v124_v19 }
  0x96   :  { %162 = vst [vmem:[%s393_s2 + $0x68] sm:$0xff] %v141_v17  ;;  %v203_v30 = vadd.f32 %v202_v24, %v188_v23 }
  0x9a   :  { %v134_v26 = vpop.f32.mrf.mxu2  ;;  %v144_v27 = vpop.f32.mrf.mxu3 }
  0x9b   :  { %v116_v28 = vpop.f32.mrf.mxu0  ;;  %v126_v29 = vpop.f32.mrf.mxu1  ;;  %159 = vst [vmem:[%s393_s2 + $0x50] sm:$0xff] %v134_v26  ;;  %v196_v54 = vmul.f32 %v134_v26, %v134_v26  ;;  %v200_v2 = vmul.f32 %v144_v27, %v144_v27 }
  0x9c   :  { %152 = vst [vmem:[%s393_s2 + $0x18] sm:$0xff] %v116_v28  ;;  %v167_v31 = vadd.f32 %v166_v25, %v116_v28  ;;  %v189_v32 = vmul.f32 %v116_v28, %v116_v28  ;;  %v193_v45 = vmul.f32 %v126_v29, %v126_v29 }
  0x9d   :  { %156 = vst [vmem:[%s393_s2 + $0x38] sm:$0xff] %v126_v29 }
  0x9e   :  { %v168_v34 = vadd.f32 %v167_v31, %v119_v11  ;;  %v204_v35 = vadd.f32 %v203_v30, %v189_v32  ;;  %163 = vst [vmem:[%s393_s2 + $0x70] sm:$0xff] %v144_v27 }
  0xa0   :  { %v205_v37 = vadd.f32 %v204_v35, %v190_v33  ;;  %v169_v38 = vadd.f32 %v168_v34, %v121_v15 }
  0xa2   :  { %v170_v40 = vadd.f32 %v169_v38, %v124_v19  ;;  %v206_v41 = vadd.f32 %v205_v37, %v191_v36  ;;  %v136_v42 = vpop.f32.mrf.mxu2  ;;  %v146_v43 = vpop.f32.mrf.mxu3 }
  0xa3   :  { %160 = vst [vmem:[%s393_s2 + $0x58] sm:$0xff] %v136_v42  ;;  %v197_v58 = vmul.f32 %v136_v42, %v136_v42  ;;  %v201_v6 = vmul.f32 %v146_v43, %v146_v43 }
  0xa4   :  { %v171_v44 = vadd.f32 %v170_v40, %v126_v29  ;;  %v207_v46 = vadd.f32 %v206_v41, %v192_v39  ;;  %164 = vst [vmem:[%s393_s2 + $0x78] sm:$0xff] %v146_v43 }
  0xa6   :  { %v172_v48 = vadd.f32 %v171_v44, %v129_v12  ;;  %v208_v49 = vadd.f32 %v207_v46, %v193_v45 }
  0xa8   :  { %v209_v51 = vadd.f32 %v208_v49, %v194_v47  ;;  %v173_v52 = vadd.f32 %v172_v48, %v131_v16 }
  0xaa   :  { %v174_v53 = vadd.f32 %v173_v52, %v134_v26  ;;  %v210_v55 = vadd.f32 %v209_v51, %v195_v50 }
  0xac   :  { %v211_v56 = vadd.f32 %v210_v55, %v196_v54  ;;  %v175_v57 = vadd.f32 %v174_v53, %v136_v42 }
  0xae   :  { %v176_v60 = vadd.f32 %v175_v57, %v139_v13  ;;  %v212_v61 = vadd.f32 %v211_v56, %v197_v58 }
  0xb0   :  { %v213_v63 = vadd.f32 %v212_v61, %v198_v59  ;;  %v177_v0 = vadd.f32 %v176_v60, %v141_v17 }
  0xb2   :  { %v178_v1 = vadd.f32 %v177_v0, %v144_v27  ;;  %v214_v3 = vadd.f32 %v213_v63, %v199_v62 }
  0xb4   :  { %v215_v4 = vadd.f32 %v214_v3, %v200_v2  ;;  %v179_v5 = vadd.f32 %v178_v1, %v146_v43 }
  0xb6   :  { %v180_v7 = vrot.slane %v179_v5, 4  ;;  %v216_v8 = vadd.f32 %v215_v4, %v201_v6 }
  0xb8   :  { %v181_v9 = vadd.f32 %v180_v7, %v179_v5  ;;  %v217_v10 = vrot.slane %v216_v8, 4 }
  0xba   :  { %v182_v11 = vrot.slane %v181_v9, 2  ;;  %v218_v12 = vadd.f32 %v217_v10, %v216_v8 }
  0xbc   :  { %v183_v14 = vadd.f32 %v182_v11, %v181_v9  ;;  %v219_v15 = vrot.slane %v218_v12, 2 }
  0xbe   :  { %v184_v16 = vrot.slane %v183_v14, 1  ;;  %v220_v13 = vadd.f32 %v219_v15, %v218_v12 }
  0xc0   :  { %v221_v18 = vrot.slane %v220_v13, 1  ;;  %v185_v19 = vadd.f32 %v184_v16, %v183_v14 }
  0xc2   :  { %v222_v17 = vadd.f32 %v221_v18, %v220_v13 }
  0xc4   :  { %v224_v20 = vsel %vm223_vm2, %v185_v19, %v222_v17 }
  0xc5   :  { %225 = vst [vmem:[%s394_s3] sm:$0x3] %v224_v20 }

// kernel: res_block_forward.9
= control target key start
LH: loop header
LB: loop body
LE: loop exit
PB: predicated region body
PF: predicated region fallthrough
CT: control target
= control target key end

     0   :  { %s454_s0 = inlined_call_operand.vmem [shape: f32[128,128], index: 0, kind: input, shape index: {}]   ;;  %s455_s1 = inlined_call_operand.vmem [shape: f32[1,128], index: 1, kind: input, shape index: {}]   ;;  %s456_s2 = inlined_call_operand.vmem [shape: f32[1,128], index: 2, kind: input, shape index: {}]   ;;  %s457_s3 = inlined_call_operand.vmem [shape: f32[128,128], index: 3, kind: input, shape index: {}]   ;;  %s458_s4 = inlined_call_operand.vmem [shape: f32[1,128], index: 4, kind: input, shape index: {}]   ;;  %s459_s5 = inlined_call_operand.vmem [shape: f32[1,128], index: 5, kind: input, shape index: {}]   ;;  %s460_s6 = inlined_call_operand.vmem [shape: f32[128,128], index: 6, kind: output, shape index: {}]  }
   0x1   :  { %v23_v0 = vld [vmem:[%s454_s0] sm:$0xff]  ;;  %v24_v7 = vld [vmem:[%s454_s0 + $0x8] sm:$0xff]  ;;  %v25_v13 = vld [vmem:[%s454_s0 + $0x10] sm:$0xff] }
   0x2   :  { %v232_v1 = vld [vmem:[%s455_s1] ss:$0 sm:$0xff]  ;;  %v80_v8 = vld [vmem:[%s457_s3 + $0x8] sm:$0xff]  ;;  %v81_v14 = vld [vmem:[%s457_s3 + $0x10] sm:$0xff] }
   0x3   :  { %v237_v2 = vld [vmem:[%s456_s2] ss:$0 sm:$0xff]  ;;  %v43_v4 = vmul.f32 %v232_v1, %v23_v0  ;;  %v44_v11 = vmul.f32 %v232_v1, %v24_v7  ;;  %v26_v15 = vld [vmem:[%s454_s0 + $0x18] sm:$0xff]  ;;  %v45_v16 = vmul.f32 %v232_v1, %v25_v13  ;;  %v28_v26 = vld [vmem:[%s454_s0 + $0x28] sm:$0xff] }
   0x4   :  { %v79_v3 = vld [vmem:[%s457_s3] sm:$0xff]  ;;  %v46_v18 = vmul.f32 %v232_v1, %v26_v15  ;;  %v82_v19 = vld [vmem:[%s457_s3 + $0x18] sm:$0xff]  ;;  %v84_v27 = vld [vmem:[%s457_s3 + $0x28] sm:$0xff]  ;;  %v48_v32 = vmul.f32 %v232_v1, %v28_v26 }
   0x5   :  { %v246_v5 = vld [vmem:[%s458_s4] ss:$0 sm:$0xff]  ;;  %v63_v9 = vadd.f32 %v237_v2, %v43_v4  ;;  %v64_v23 = vadd.f32 %v237_v2, %v44_v11  ;;  %v29_v28 = vld [vmem:[%s454_s0 + $0x30] sm:$0xff]  ;;  %v65_v29 = vadd.f32 %v237_v2, %v45_v16  ;;  %v30_v42 = vld [vmem:[%s454_s0 + $0x38] sm:$0xff] }
   0x6   :  { %v251_v6 = vld [vmem:[%s459_s5] ss:$0 sm:$0xff]  ;;  %v99_v10 = vmul.f32 %v246_v5, %v79_v3  ;;  %v100_v12 = vmul.f32 %v246_v5, %v80_v8  ;;  %v101_v17 = vmul.f32 %v246_v5, %v81_v14  ;;  %v102_v24 = vmul.f32 %v246_v5, %v82_v19  ;;  %v85_v33 = vld [vmem:[%s457_s3 + $0x30] sm:$0xff]  ;;  %v86_v43 = vld [vmem:[%s457_s3 + $0x38] sm:$0xff] }
   0x7   :  { %v27_v20 = vld [vmem:[%s454_s0 + $0x20] sm:$0xff]  ;;  %v66_v30 = vadd.f32 %v237_v2, %v46_v18  ;;  %v104_v37 = vmul.f32 %v246_v5, %v84_v27  ;;  %v68_v40 = vadd.f32 %v237_v2, %v48_v32  ;;  %v49_v41 = vmul.f32 %v232_v1, %v29_v28  ;;  %v32_v58 = vld [vmem:[%s454_s0 + $0x48] sm:$0xff]  ;;  %v33_v0 = vld [vmem:[%s454_s0 + $0x50] sm:$0xff] }
   0x8   :  { %v83_v21 = vld [vmem:[%s457_s3 + $0x20] sm:$0xff]  ;;  %v115_v22 = vadd.f32 %v99_v10, %v63_v9  ;;  %v47_v25 = vmul.f32 %v232_v1, %v27_v20  ;;  %v116_v35 = vadd.f32 %v100_v12, %v64_v23  ;;  %v117_v38 = vadd.f32 %v101_v17, %v65_v29  ;;  %v88_v59 = vld [vmem:[%s457_s3 + $0x48] sm:$0xff]  ;;  %v89_v3 = vld [vmem:[%s457_s3 + $0x50] sm:$0xff] }
   0x9   :  { %v103_v31 = vmul.f32 %v246_v5, %v83_v21  ;;  %v118_v39 = vadd.f32 %v102_v24, %v66_v30  ;;  %v105_v47 = vmul.f32 %v246_v5, %v85_v33  ;;  %v120_v50 = vadd.f32 %v104_v37, %v68_v40  ;;  %v31_v52 = vld [vmem:[%s454_s0 + $0x40] sm:$0xff]  ;;  %v34_v10 = vld [vmem:[%s454_s0 + $0x58] sm:$0xff] }
   0xa   :  { %v135_v34 = vadd.f32 %v251_v6, %v115_v22  ;;  %v67_v36 = vadd.f32 %v237_v2, %v47_v25  ;;  %v136_v45 = vadd.f32 %v251_v6, %v116_v35  ;;  %v137_v48 = vadd.f32 %v251_v6, %v117_v38  ;;  %v87_v53 = vld [vmem:[%s457_s3 + $0x40] sm:$0xff]  ;;  %v90_v11 = vld [vmem:[%s457_s3 + $0x58] sm:$0xff]  ;;  %v36_v22 = vld [vmem:[%s454_s0 + $0x68] sm:$0xff] }
   0xb   :  { %v138_v49 = vadd.f32 %v251_v6, %v118_v39  ;;  %v69_v51 = vadd.f32 %v237_v2, %v49_v41  ;;  %v50_v56 = vmul.f32 %v232_v1, %v30_v42  ;;  %v106_v57 = vmul.f32 %v246_v5, %v86_v43  ;;  %v35_v16 = vld [vmem:[%s454_s0 + $0x60] sm:$0xff]  ;;  %v93_v41 = vld [vmem:[%s457_s3 + $0x70] sm:$0xff] }
   0xc   :  { %v151_v44 = vmax.f32 %v135_v34, 0.0  ;;  %v119_v46 = vadd.f32 %v103_v31, %v67_v36  ;;  %v152_v54 = vmax.f32 %v136_v45, 0.0  ;;  %v153_v60 = vmax.f32 %v137_v48, 0.0  ;;  %v91_v21 = vld [vmem:[%s457_s3 + $0x60] sm:$0xff]  ;;  %v92_v31 = vld [vmem:[%s457_s3 + $0x68] sm:$0xff]  ;;  %v37_v36 = vld [vmem:[%s454_s0 + $0x70] sm:$0xff] }
   0xd   :  { %v154_v61 = vmax.f32 %v138_v49, 0.0  ;;  %v140_v62 = vadd.f32 %v251_v6, %v120_v50  ;;  %v121_v63 = vadd.f32 %v105_v47, %v69_v51  ;;  %v70_v7 = vadd.f32 %v237_v2, %v50_v56  ;;  %v94_v51 = vld [vmem:[%s457_s3 + $0x78] sm:$0xff] }
   0xe   :  { %167 = vst [vmem:[%s460_s6] sm:$0xff] %v151_v44  ;;  %v139_v55 = vadd.f32 %v251_v6, %v119_v46  ;;  %v51_v8 = vmul.f32 %v232_v1, %v31_v52  ;;  %v107_v9 = vmul.f32 %v246_v5, %v87_v53  ;;  %v52_v14 = vmul.f32 %v232_v1, %v32_v58  ;;  %v38_v46 = vld [vmem:[%s454_s0 + $0x78] sm:$0xff] }
   0xf   :  { %168 = vst [vmem:[%s460_s6 + $0x8] sm:$0xff] %v152_v54  ;;  %v156_v12 = vmax.f32 %v140_v62, 0.0  ;;  %v141_v13 = vadd.f32 %v251_v6, %v121_v63  ;;  %v108_v15 = vmul.f32 %v246_v5, %v88_v59  ;;  %v122_v17 = vadd.f32 %v106_v57, %v70_v7 }
  0x10   :  { %v155_v4 = vmax.f32 %v139_v55, 0.0  ;;  %169 = vst [vmem:[%s460_s6 + $0x10] sm:$0xff] %v153_v60  ;;  %v71_v18 = vadd.f32 %v237_v2, %v51_v8  ;;  %v53_v19 = vmul.f32 %v232_v1, %v33_v0  ;;  %v109_v20 = vmul.f32 %v246_v5, %v89_v3 }
  0x11   :  { %170 = vst [vmem:[%s460_s6 + $0x18] sm:$0xff] %v154_v61  ;;  %v157_v23 = vmax.f32 %v141_v13, 0.0  ;;  %v72_v24 = vadd.f32 %v237_v2, %v52_v14  ;;  %v54_v25 = vmul.f32 %v232_v1, %v34_v10  ;;  %v110_v26 = vmul.f32 %v246_v5, %v90_v11 }
  0x12   :  { %171 = vst [vmem:[%s460_s6 + $0x20] sm:$0xff] %v155_v4  ;;  %v142_v27 = vadd.f32 %v251_v6, %v122_v17  ;;  %v123_v28 = vadd.f32 %v107_v9, %v71_v18  ;;  %v73_v29 = vadd.f32 %v237_v2, %v53_v19  ;;  %v55_v30 = vmul.f32 %v232_v1, %v35_v16 }
  0x13   :  { %172 = vst [vmem:[%s460_s6 + $0x28] sm:$0xff] %v156_v12  ;;  %v124_v32 = vadd.f32 %v108_v15, %v72_v24  ;;  %v74_v33 = vadd.f32 %v237_v2, %v54_v25  ;;  %v111_v34 = vmul.f32 %v246_v5, %v91_v21  ;;  %v56_v35 = vmul.f32 %v232_v1, %v36_v22 }
  0x14   :  { %173 = vst [vmem:[%s460_s6 + $0x30] sm:$0xff] %v157_v23  ;;  %v158_v37 = vmax.f32 %v142_v27, 0.0  ;;  %v143_v38 = vadd.f32 %v251_v6, %v123_v28  ;;  %v125_v39 = vadd.f32 %v109_v20, %v73_v29  ;;  %v75_v40 = vadd.f32 %v237_v2, %v55_v30 }
  0x15   :  { %v144_v42 = vadd.f32 %v251_v6, %v124_v32  ;;  %v126_v43 = vadd.f32 %v110_v26, %v74_v33  ;;  %v76_v44 = vadd.f32 %v237_v2, %v56_v35  ;;  %v112_v45 = vmul.f32 %v246_v5, %v92_v31 }
  0x16   :  { %174 = vst [vmem:[%s460_s6 + $0x38] sm:$0xff] %v158_v37  ;;  %v159_v47 = vmax.f32 %v143_v38, 0.0  ;;  %v145_v48 = vadd.f32 %v251_v6, %v125_v39  ;;  %v127_v49 = vadd.f32 %v111_v34, %v75_v40  ;;  %v57_v50 = vmul.f32 %v232_v1, %v37_v36 }
  0x17   :  { %v160_v52 = vmax.f32 %v144_v42, 0.0  ;;  %v146_v53 = vadd.f32 %v251_v6, %v126_v43  ;;  %v128_v54 = vadd.f32 %v112_v45, %v76_v44  ;;  %v113_v55 = vmul.f32 %v246_v5, %v93_v41 }
  0x18   :  { %175 = vst [vmem:[%s460_s6 + $0x40] sm:$0xff] %v159_v47  ;;  %v161_v56 = vmax.f32 %v145_v48, 0.0  ;;  %v147_v57 = vadd.f32 %v251_v6, %v127_v49  ;;  %v77_v58 = vadd.f32 %v237_v2, %v57_v50  ;;  %v58_v59 = vmul.f32 %v232_v1, %v38_v46 }
  0x19   :  { %176 = vst [vmem:[%s460_s6 + $0x48] sm:$0xff] %v160_v52  ;;  %v162_v60 = vmax.f32 %v146_v53, 0.0  ;;  %v148_v61 = vadd.f32 %v251_v6, %v128_v54  ;;  %v114_v62 = vmul.f32 %v246_v5, %v94_v51 }
  0x1a   :  { %177 = vst [vmem:[%s460_s6 + $0x50] sm:$0xff] %v161_v56  ;;  %v163_v63 = vmax.f32 %v147_v57, 0.0  ;;  %v129_v0 = vadd.f32 %v113_v55, %v77_v58  ;;  %v78_v3 = vadd.f32 %v237_v2, %v58_v59 }
  0x1b   :  { %178 = vst [vmem:[%s460_s6 + $0x58] sm:$0xff] %v162_v60  ;;  %v164_v1 = vmax.f32 %v148_v61, 0.0 }
  0x1c   :  { %179 = vst [vmem:[%s460_s6 + $0x60] sm:$0xff] %v163_v63  ;;  %v149_v4 = vadd.f32 %v251_v6, %v129_v0  ;;  %v130_v5 = vadd.f32 %v114_v62, %v78_v3 }
  0x1d   :  { %180 = vst [vmem:[%s460_s6 + $0x68] sm:$0xff] %v164_v1 }
  0x1e   :  { %v165_v7 = vmax.f32 %v149_v4, 0.0  ;;  %v150_v8 = vadd.f32 %v251_v6, %v130_v5 }
  0x20   :  { %181 = vst [vmem:[%s460_s6 + $0x70] sm:$0xff] %v165_v7  ;;  %v166_v2 = vmax.f32 %v150_v8, 0.0 }
  0x22   :  { %182 = vst [vmem:[%s460_s6 + $0x78] sm:$0xff] %v166_v2 }

// kernel: res_block_forward.8
= control target key start
LH: loop header
LB: loop body
LE: loop exit
PB: predicated region body
PF: predicated region fallthrough
CT: control target
= control target key end

     0   :  { %vm1552_vm0 = vcmask 1040384   ;;  %s3110_s1 = inlined_call_operand.vmem [shape: bf16[1152,128], index: 1, kind: input, shape index: {}]   ;;  %s3111_s0 = inlined_call_operand.vmem [shape: bf16[128,1152], index: 0, kind: input, shape index: {}]   ;;  %s3112_s2 = inlined_call_operand.vmem [shape: f32[128,128], index: 2, kind: output, shape index: {0}]   ;;  %s3113_s3 = inlined_call_operand.vmem [shape: f32[1,2,128], index: 3, kind: output, shape index: {1}]  }
   0x1   :  { %v2218_v0 = vld [vmem:[%s3110_s1 + $0x38] sm:$0xff]  ;;  %v2217_v1 = vld [vmem:[%s3110_s1 + $0x30] sm:$0xff]  ;;  %v2216_v2 = vld [vmem:[%s3110_s1 + $0x28] sm:$0xff] }
   0x2   :  { %2283 = vmatpush.bf16.msra.mxu1 %v2218_v0  ;;  %2284 = vmatpush.bf16.msra.mxu2 %v2218_v0  ;;  %v2215_v3 = vld [vmem:[%s3110_s1 + $0x20] sm:$0xff]  ;;  %v2214_v4 = vld [vmem:[%s3110_s1 + $0x18] sm:$0xff]  ;;  %v2213_v5 = vld [vmem:[%s3110_s1 + $0x10] sm:$0xff] }
   0x3   :  { %2285 = vmatpush.bf16.msra.mxu3 %v2218_v0  ;;  %1037 = vmatpush.bf16.msra.mxu0 %v2218_v0  ;;  %v2212_v6 = vld [vmem:[%s3110_s1 + $0x8] sm:$0xff]  ;;  %v2211_v7 = vld [vmem:[%s3110_s1] sm:$0xff]  ;;  %v1637_v8 = vld [vmem:[%s3111_s0 + $0x90] sm:$0xf] }
   0x4   :  { %v2161_v9 = vld [vmem:[%s3111_s0 + $0xb0] sm:$0xf0]  ;;  %v1709_v10 = vld [vmem:[%s3111_s0 + $0x120] sm:$0xf]  ;;  %v2179_v11 = vld [vmem:[%s3111_s0 + $0x140] sm:$0xf0] }
   0x5   :  { %v1781_v12 = vld [vmem:[%s3111_s0 + $0x1b0] sm:$0xf]  ;;  %v2197_v13 = vld [vmem:[%s3111_s0 + $0x1d0] sm:$0xf0]  ;;  %v1565_v14 = vld [vmem:[%s3111_s0] sm:$0xf]  ;;  %v1638_v18 = vor.u32 %v2161_v9, %v1637_v8  ;;  %v1710_v19 = vor.u32 %v2179_v11, %v1709_v10 }
   0x6   :  { %2286 = vmatpush.bf16.msra.mxu1 %v2217_v1  ;;  %2287 = vmatpush.bf16.msra.mxu2 %v2217_v1  ;;  %v2143_v15 = vld [vmem:[%s3111_s0 + $0x20] sm:$0xf0]  ;;  %v2234_v16 = vld [vmem:[%s3110_s1 + $0xb8] sm:$0xff]  ;;  %v1782_v20 = vor.u32 %v2197_v13, %v1781_v12  ;;  %v2233_v24 = vld [vmem:[%s3110_s1 + $0xb0] sm:$0xff] }
   0x7   :  { %2288 = vmatpush.bf16.msra.mxu3 %v2217_v1  ;;  %1038 = vmatpush.bf16.msra.mxu0 %v2217_v1  ;;  %v2226_v17 = vld [vmem:[%s3110_s1 + $0x78] sm:$0xff]  ;;  %v1566_v21 = vor.u32 %v2143_v15, %v1565_v14  ;;  %v2225_v25 = vld [vmem:[%s3110_s1 + $0x70] sm:$0xff]  ;;  %v2232_v28 = vld [vmem:[%s3110_s1 + $0xa8] sm:$0xff] }
   0x8   :  { %v2242_v22 = vld [vmem:[%s3110_s1 + $0xf8] sm:$0xff]  ;;  %v2241_v26 = vld [vmem:[%s3110_s1 + $0xf0] sm:$0xff]  ;;  %v2224_v29 = vld [vmem:[%s3110_s1 + $0x68] sm:$0xff] }
   0x9   :  { %v2250_v23 = vld [vmem:[%s3110_s1 + $0x138] sm:$0xff]  ;;  %v2249_v27 = vld [vmem:[%s3110_s1 + $0x130] sm:$0xff]  ;;  %v2240_v30 = vld [vmem:[%s3110_s1 + $0xe8] sm:$0xff] }
   0xa   :  { %2289 = vmatpush.bf16.msra.mxu1 %v2216_v2  ;;  %2290 = vmatpush.bf16.msra.mxu2 %v2216_v2  ;;  %v2248_v31 = vld [vmem:[%s3110_s1 + $0x128] sm:$0xff]  ;;  %v2231_v32 = vld [vmem:[%s3110_s1 + $0xa0] sm:$0xff]  ;;  %v1673_v36 = vld [vmem:[%s3111_s0 + $0xd8] sm:$0xf] }
   0xb   :  { %2291 = vmatpush.bf16.msra.mxu3 %v2216_v2  ;;  %1039 = vmatpush.bf16.msra.mxu0 %v2216_v2  ;;  %v2223_v33 = vld [vmem:[%s3110_s1 + $0x60] sm:$0xff]  ;;  %v2170_v37 = vld [vmem:[%s3111_s0 + $0xf8] sm:$0xf0]  ;;  %v1745_v38 = vld [vmem:[%s3111_s0 + $0x168] sm:$0xf] }
   0xc   :  { %v2239_v34 = vld [vmem:[%s3110_s1 + $0xe0] sm:$0xff]  ;;  %v2188_v39 = vld [vmem:[%s3111_s0 + $0x188] sm:$0xf0]  ;;  %v1817_v40 = vld [vmem:[%s3111_s0 + $0x1f8] sm:$0xf]  ;;  %v1674_v46 = vor.u32 %v2170_v37, %v1673_v36 }
   0xd   :  { %v2247_v35 = vld [vmem:[%s3110_s1 + $0x120] sm:$0xff]  ;;  %v2206_v41 = vld [vmem:[%s3111_s0 + $0x218] sm:$0xf0]  ;;  %v1601_v42 = vld [vmem:[%s3111_s0 + $0x48] sm:$0xf]  ;;  %v1746_v47 = vor.u32 %v2188_v39, %v1745_v38 }
   0xe   :  { %2292 = vmatpush.bf16.msra.mxu1 %v2215_v3  ;;  %2293 = vmatpush.bf16.msra.mxu2 %v2215_v3  ;;  %v2152_v43 = vld [vmem:[%s3111_s0 + $0x68] sm:$0xf0]  ;;  %v2230_v44 = vld [vmem:[%s3110_s1 + $0x98] sm:$0xff]  ;;  %v1818_v48 = vor.u32 %v2206_v41, %v1817_v40  ;;  %v2229_v52 = vld [vmem:[%s3110_s1 + $0x90] sm:$0xff] }
   0xf   :  { %2294 = vmatpush.bf16.msra.mxu3 %v2215_v3  ;;  %1040 = vmatpush.bf16.msra.mxu0 %v2215_v3  ;;  %v2222_v45 = vld [vmem:[%s3110_s1 + $0x58] sm:$0xff]  ;;  %v1602_v49 = vor.u32 %v2152_v43, %v1601_v42  ;;  %v2221_v53 = vld [vmem:[%s3110_s1 + $0x50] sm:$0xff]  ;;  %v2228_v56 = vld [vmem:[%s3110_s1 + $0x88] sm:$0xff] }
  0x10   :  { %v2238_v50 = vld [vmem:[%s3110_s1 + $0xd8] sm:$0xff]  ;;  %v2237_v54 = vld [vmem:[%s3110_s1 + $0xd0] sm:$0xff]  ;;  %v2220_v57 = vld [vmem:[%s3110_s1 + $0x48] sm:$0xff] }
  0x11   :  { %v2246_v51 = vld [vmem:[%s3110_s1 + $0x118] sm:$0xff]  ;;  %v2245_v55 = vld [vmem:[%s3110_s1 + $0x110] sm:$0xff]  ;;  %v2236_v58 = vld [vmem:[%s3110_s1 + $0xc8] sm:$0xff] }
  0x12   :  { %2295 = vmatpush.bf16.msra.mxu1 %v2214_v4  ;;  %2296 = vmatpush.bf16.msra.mxu2 %v2214_v4  ;;  %v2244_v59 = vld [vmem:[%s3110_s1 + $0x108] sm:$0xff]  ;;  %v2227_v60 = vld [vmem:[%s3110_s1 + $0x80] sm:$0xff]  ;;  %v2266_v2 = vld [vmem:[%s3110_s1 + $0x1b8] sm:$0xff] }
  0x13   :  { %2297 = vmatpush.bf16.msra.mxu3 %v2214_v4  ;;  %1041 = vmatpush.bf16.msra.mxu0 %v2214_v4  ;;  %v2219_v61 = vld [vmem:[%s3110_s1 + $0x40] sm:$0xff]  ;;  %v1567_v1 = vld [vmem:[%s3111_s0 + $0x24] sm:$0xf0]  ;;  %v2258_v3 = vld [vmem:[%s3110_s1 + $0x178] sm:$0xff] }
  0x14   :  { %v2139_v62 = vld [vmem:[%s3111_s0 + $0x4] sm:$0xf]  ;;  %v1573_v4 = vld [vmem:[%s3111_s0 + $0x8] sm:$0xf]  ;;  %v1581_v8 = vld [vmem:[%s3111_s0 + $0x10] sm:$0xf] }
  0x15   :  { %v2235_v63 = vld [vmem:[%s3110_s1 + $0xc0] sm:$0xff]  ;;  %v2145_v9 = vld [vmem:[%s3111_s0 + $0x30] sm:$0xf0]  ;;  %v2274_v10 = vld [vmem:[%s3110_s1 + $0x1f8] sm:$0xff]  ;;  %v1570_v12 = vor.u32 %v2139_v62, %v1567_v1 }
  0x16   :  { %2298 = vmatpush.bf16.msra.mxu1 %v2213_v5  ;;  %2299 = vmatpush.bf16.msra.mxu2 %v2213_v5  ;;  %v2243_v0 = vld [vmem:[%s3110_s1 + $0x100] sm:$0xff]  ;;  %v2282_v11 = vld [vmem:[%s3110_s1 + $0x238] sm:$0xff]  ;;  %v1582_v15 = vor.u32 %v2145_v9, %v1581_v8  ;;  %v2157_v40 = vld [vmem:[%s3111_s0 + $0x94] sm:$0xf] }
  0x17   :  { %2300 = vmatpush.bf16.msra.mxu3 %v2213_v5  ;;  %1042 = vmatpush.bf16.msra.mxu0 %v2213_v5  ;;  %v2144_v5 = vld [vmem:[%s3111_s0 + $0x28] sm:$0xf0]  ;;  %v2263_v36 = vld [vmem:[%s3110_s1 + $0x1a0] sm:$0xff]  ;;  %v1639_v41 = vld [vmem:[%s3111_s0 + $0xb4] sm:$0xf0] }
  0x18   :  { %v1574_v13 = vor.u32 %v2144_v5, %v1573_v4  ;;  %v2271_v37 = vld [vmem:[%s3110_s1 + $0x1e0] sm:$0xff]  ;;  %v1645_v42 = vld [vmem:[%s3111_s0 + $0x98] sm:$0xf]  ;;  %v2162_v43 = vld [vmem:[%s3111_s0 + $0xb8] sm:$0xf0] }
  0x19   :  { %v2255_v38 = vld [vmem:[%s3110_s1 + $0x160] sm:$0xff]  ;;  %v1689_v62 = vld [vmem:[%s3111_s0 + $0xe8] sm:$0xf]  ;;  %v2261_v4 = vld [vmem:[%s3110_s1 + $0x190] sm:$0xff] }
  0x1a   :  { %2301 = vmatpush.bf16.msra.mxu1 %v2212_v6  ;;  %2302 = vmatpush.bf16.msra.mxu2 %v2212_v6  ;;  %v2279_v39 = vld [vmem:[%s3110_s1 + $0x220] sm:$0xff]  ;;  %v2269_v5 = vld [vmem:[%s3110_s1 + $0x1d0] sm:$0xff]  ;;  %v1711_v9 = vld [vmem:[%s3111_s0 + $0x144] sm:$0xf0] }
  0x1b   :  { %2303 = vmatpush.bf16.msra.mxu3 %v2212_v6  ;;  %1043 = vmatpush.bf16.msra.mxu0 %v2212_v6  ;;  %v2140_v6 = vld [vmem:[%s3111_s0 + $0xc] sm:$0xf]  ;;  %v2175_v8 = vld [vmem:[%s3111_s0 + $0x124] sm:$0xf] }
  0x1e   :  { %2304 = vmatpush.bf16.msra.mxu1 %v2211_v7  ;;  %2305 = vmatpush.bf16.msra.mxu2 %v2211_v7 }
  0x1f   :  { %2306 = vmatpush.bf16.msra.mxu3 %v2211_v7  ;;  %1044 = vmatpush.bf16.msra.mxu0 %v2211_v7  ;;  %v1575_v7 = vld [vmem:[%s3111_s0 + $0x2c] sm:$0xf0] }
  0x20   :  { %v1578_v14 = vor.u32 %v2140_v6, %v1575_v7  ;;  %v2253_v6 = vld [vmem:[%s3110_s1 + $0x150] sm:$0xff] }
  0x21   :  { %1055 = vmatmul.bf16.vlgmr.msra.gmra.mxu1 %v1638_v18  ;;  %1065 = vmatmul.bf16.vlgmr.msra.gmra.mxu2 %v1710_v19  ;;  %v2273_v18 = vld [vmem:[%s3110_s1 + $0x1f0] sm:$0xff] }
  0x22   :  { %1135 = vmatpush.bf16.msrb.mxu2 %v2234_v16  ;;  %1086 = vmatpush.bf16.msrb.mxu1 %v2226_v17  ;;  %v2265_v16 = vld [vmem:[%s3110_s1 + $0x1b0] sm:$0xff] }
  0x23   :  { %1075 = vmatmul.bf16.vlgmr.msra.gmra.mxu3 %v1782_v20  ;;  %1045 = vmatmul.bf16.vlgmr.msra.gmra.mxu0 %v1566_v21  ;;  %v2257_v17 = vld [vmem:[%s3110_s1 + $0x170] sm:$0xff]  ;;  %v2264_v20 = vld [vmem:[%s3110_s1 + $0x1a8] sm:$0xff] }
  0x24   :  { %1184 = vmatpush.bf16.msrb.mxu3 %v2242_v22  ;;  %1233 = vmatpush.bf16.msrb.mxu0 %v2250_v23  ;;  %v2281_v19 = vld [vmem:[%s3110_s1 + $0x230] sm:$0xff]  ;;  %v2256_v21 = vld [vmem:[%s3110_s1 + $0x168] sm:$0xff] }
  0x25   :  { %v2272_v22 = vld [vmem:[%s3110_s1 + $0x1e8] sm:$0xff]  ;;  %v2277_v7 = vld [vmem:[%s3110_s1 + $0x210] sm:$0xff] }
  0x26   :  { %1136 = vmatpush.bf16.msrb.mxu2 %v2233_v24  ;;  %1087 = vmatpush.bf16.msrb.mxu1 %v2225_v25  ;;  %v2280_v23 = vld [vmem:[%s3110_s1 + $0x228] sm:$0xff]  ;;  %v1603_v25 = vld [vmem:[%s3111_s0 + $0x6c] sm:$0xf0] }
  0x27   :  { %v2148_v24 = vld [vmem:[%s3111_s0 + $0x4c] sm:$0xf] }
  0x28   :  { %1185 = vmatpush.bf16.msrb.mxu3 %v2241_v26  ;;  %1234 = vmatpush.bf16.msrb.mxu0 %v2249_v27  ;;  %v1609_v26 = vld [vmem:[%s3111_s0 + $0x50] sm:$0xf]  ;;  %v2153_v27 = vld [vmem:[%s3111_s0 + $0x70] sm:$0xf0] }
  0x2a   :  { %1137 = vmatpush.bf16.msrb.mxu2 %v2232_v28  ;;  %1088 = vmatpush.bf16.msrb.mxu1 %v2224_v29  ;;  %v2149_v28 = vld [vmem:[%s3111_s0 + $0x54] sm:$0xf]  ;;  %v1611_v29 = vld [vmem:[%s3111_s0 + $0x74] sm:$0xf0] }
  0x2c   :  { %1186 = vmatpush.bf16.msrb.mxu3 %v2240_v30  ;;  %1235 = vmatpush.bf16.msrb.mxu0 %v2248_v31  ;;  %v1617_v30 = vld [vmem:[%s3111_s0 + $0x58] sm:$0xf]  ;;  %v2154_v31 = vld [vmem:[%s3111_s0 + $0x78] sm:$0xf0] }
  0x2e   :  { %1138 = vmatpush.bf16.msrb.mxu2 %v2231_v32  ;;  %1089 = vmatpush.bf16.msrb.mxu1 %v2223_v33  ;;  %v1606_v32 = vor.u32 %v2148_v24, %v1603_v25  ;;  %v1610_v33 = vor.u32 %v2153_v27, %v1609_v26  ;;  %v2184_v24 = vld [vmem:[%s3111_s0 + $0x16c] sm:$0xf]  ;;  %v1747_v25 = vld [vmem:[%s3111_s0 + $0x18c] sm:$0xf0]  ;;  %v2189_v27 = vld [vmem:[%s3111_s0 + $0x190] sm:$0xf0] }
  0x2f   :  { %v1753_v26 = vld [vmem:[%s3111_s0 + $0x170] sm:$0xf] }
  0x30   :  { %1187 = vmatpush.bf16.msrb.mxu3 %v2239_v34  ;;  %1236 = vmatpush.bf16.msrb.mxu0 %v2247_v35  ;;  %v1614_v34 = vor.u32 %v2149_v28, %v1611_v29  ;;  %v1618_v35 = vor.u32 %v2154_v31, %v1617_v30  ;;  %v2185_v28 = vld [vmem:[%s3111_s0 + $0x174] sm:$0xf]  ;;  %v1755_v29 = vld [vmem:[%s3111_s0 + $0x194] sm:$0xf0]  ;;  %v2190_v31 = vld [vmem:[%s3111_s0 + $0x198] sm:$0xf0] }
  0x31   :  { %1060 = vmatmul.bf16.gmra.mxu1 %v1674_v46  ;;  %1070 = vmatmul.bf16.gmra.mxu2 %v1746_v47  ;;  %v1653_v46 = vld [vmem:[%s3111_s0 + $0xa0] sm:$0xf]  ;;  %v2163_v47 = vld [vmem:[%s3111_s0 + $0xc0] sm:$0xf0]  ;;  %v1761_v30 = vld [vmem:[%s3111_s0 + $0x178] sm:$0xf] }
  0x32   :  { %1139 = vmatpush.bf16.msrb.mxu2 %v2230_v44  ;;  %1090 = vmatpush.bf16.msrb.mxu1 %v2222_v45  ;;  %v2158_v44 = vld [vmem:[%s3111_s0 + $0x9c] sm:$0xf]  ;;  %v1647_v45 = vld [vmem:[%s3111_s0 + $0xbc] sm:$0xf0] }
  0x33   :  { %1080 = vmatmul.bf16.gmra.mxu3 %v1818_v48  ;;  %1050 = vmatmul.bf16.gmra.mxu0 %v1602_v49  ;;  %v1642_v48 = vor.u32 %v2157_v40, %v1639_v41  ;;  %v1646_v49 = vor.u32 %v2162_v43, %v1645_v42  ;;  %v2193_v40 = vld [vmem:[%s3111_s0 + $0x1b4] sm:$0xf]  ;;  %v1783_v41 = vld [vmem:[%s3111_s0 + $0x1d4] sm:$0xf0]  ;;  %v2198_v43 = vld [vmem:[%s3111_s0 + $0x1d8] sm:$0xf0] }
  0x34   :  { %1188 = vmatpush.bf16.msrb.mxu3 %v2238_v50  ;;  %1237 = vmatpush.bf16.msrb.mxu0 %v2246_v51  ;;  %v1650_v50 = vor.u32 %v2158_v44, %v1647_v45  ;;  %v1654_v51 = vor.u32 %v2163_v47, %v1653_v46  ;;  %v1789_v42 = vld [vmem:[%s3111_s0 + $0x1b8] sm:$0xf]  ;;  %v2194_v44 = vld [vmem:[%s3111_s0 + $0x1bc] sm:$0xf]  ;;  %v1791_v45 = vld [vmem:[%s3111_s0 + $0x1dc] sm:$0xf0] }
  0x35   :  { %v1797_v46 = vld [vmem:[%s3111_s0 + $0x1c0] sm:$0xf]  ;;  %v2199_v47 = vld [vmem:[%s3111_s0 + $0x1e0] sm:$0xf0] }
  0x36   :  { %1140 = vmatpush.bf16.msrb.mxu2 %v2229_v52  ;;  %1091 = vmatpush.bf16.msrb.mxu1 %v2221_v53  ;;  %v2262_v52 = vld [vmem:[%s3110_s1 + $0x198] sm:$0xff] }
  0x37   :  { %v2270_v53 = vld [vmem:[%s3110_s1 + $0x1d8] sm:$0xff] }
  0x38   :  { %1189 = vmatpush.bf16.msrb.mxu3 %v2237_v54  ;;  %1238 = vmatpush.bf16.msrb.mxu0 %v2245_v55  ;;  %v2254_v54 = vld [vmem:[%s3110_s1 + $0x158] sm:$0xff] }
  0x39   :  { %v2278_v55 = vld [vmem:[%s3110_s1 + $0x218] sm:$0xff] }
  0x3a   :  { %1141 = vmatpush.bf16.msrb.mxu2 %v2228_v56  ;;  %1092 = vmatpush.bf16.msrb.mxu1 %v2220_v57  ;;  %v2166_v56 = vld [vmem:[%s3111_s0 + $0xdc] sm:$0xf]  ;;  %v1675_v57 = vld [vmem:[%s3111_s0 + $0xfc] sm:$0xf0] }
  0x3c   :  { %1190 = vmatpush.bf16.msrb.mxu3 %v2236_v58  ;;  %1239 = vmatpush.bf16.msrb.mxu0 %v2244_v59  ;;  %v1681_v58 = vld [vmem:[%s3111_s0 + $0xe0] sm:$0xf]  ;;  %v2171_v59 = vld [vmem:[%s3111_s0 + $0x100] sm:$0xf0] }
  0x3d   :  { %v1682_v1 = vor.u32 %v2171_v59, %v1681_v58  ;;  %v2202_v58 = vld [vmem:[%s3111_s0 + $0x1fc] sm:$0xf]  ;;  %v1819_v59 = vld [vmem:[%s3111_s0 + $0x21c] sm:$0xf0] }
  0x3e   :  { %1142 = vmatpush.bf16.msrb.mxu2 %v2227_v60  ;;  %1093 = vmatpush.bf16.msrb.mxu1 %v2219_v61  ;;  %v2167_v60 = vld [vmem:[%s3111_s0 + $0xe4] sm:$0xf]  ;;  %v1683_v61 = vld [vmem:[%s3111_s0 + $0x104] sm:$0xf0] }
  0x40   :  { %1191 = vmatpush.bf16.msrb.mxu3 %v2235_v63  ;;  %1240 = vmatpush.bf16.msrb.mxu0 %v2243_v0  ;;  %v2172_v63 = vld [vmem:[%s3111_s0 + $0x108] sm:$0xf0]  ;;  %v1678_v0 = vor.u32 %v2166_v56, %v1675_v57 }
  0x41   :  { %1094 = vmatmul.bf16.vlgmr.msrb.gmra.mxu1 %v1570_v12  ;;  %1143 = vmatmul.bf16.vlgmr.msrb.gmra.mxu2 %v1574_v13  ;;  %v2176_v12 = vld [vmem:[%s3111_s0 + $0x12c] sm:$0xf]  ;;  %v1719_v13 = vld [vmem:[%s3111_s0 + $0x14c] sm:$0xf0] }
  0x42   :  { %1331 = vmatpush.bf16.msra.mxu2 %v2266_v2  ;;  %1282 = vmatpush.bf16.msra.mxu1 %v2258_v3  ;;  %v1686_v2 = vor.u32 %v2167_v60, %v1683_v61  ;;  %v1690_v3 = vor.u32 %v2172_v63, %v1689_v62  ;;  %v1825_v60 = vld [vmem:[%s3111_s0 + $0x200] sm:$0xf]  ;;  %v2207_v61 = vld [vmem:[%s3111_s0 + $0x220] sm:$0xf0]  ;;  %v1827_v63 = vld [vmem:[%s3111_s0 + $0x224] sm:$0xf0] }
  0x43   :  { %1192 = vmatmul.bf16.vlgmr.msrb.gmra.mxu3 %v1578_v14  ;;  %1241 = vmatmul.bf16.vlgmr.msrb.gmra.mxu0 %v1582_v15  ;;  %v1725_v14 = vld [vmem:[%s3111_s0 + $0x130] sm:$0xf]  ;;  %v2181_v15 = vld [vmem:[%s3111_s0 + $0x150] sm:$0xf0]  ;;  %v2203_v62 = vld [vmem:[%s3111_s0 + $0x204] sm:$0xf] }
  0x44   :  { %1380 = vmatpush.bf16.msra.mxu3 %v2274_v10  ;;  %1429 = vmatpush.bf16.msra.mxu0 %v2282_v11  ;;  %v1717_v10 = vld [vmem:[%s3111_s0 + $0x128] sm:$0xf]  ;;  %v2180_v11 = vld [vmem:[%s3111_s0 + $0x148] sm:$0xf0] }
  0x46   :  { %1332 = vmatpush.bf16.msra.mxu2 %v2265_v16  ;;  %1283 = vmatpush.bf16.msra.mxu1 %v2257_v17  ;;  %v1714_v16 = vor.u32 %v2175_v8, %v1711_v9  ;;  %v1718_v17 = vor.u32 %v2180_v11, %v1717_v10 }
  0x48   :  { %1381 = vmatpush.bf16.msra.mxu3 %v2273_v18  ;;  %1430 = vmatpush.bf16.msra.mxu0 %v2281_v19  ;;  %v1722_v18 = vor.u32 %v2176_v12, %v1719_v13  ;;  %v1726_v19 = vor.u32 %v2181_v15, %v1725_v14  ;;  %v2141_v14 = vld [vmem:[%s3111_s0 + $0x14] sm:$0xf]  ;;  %v1583_v15 = vld [vmem:[%s3111_s0 + $0x34] sm:$0xf0] }
  0x4a   :  { %1333 = vmatpush.bf16.msra.mxu2 %v2264_v20  ;;  %1284 = vmatpush.bf16.msra.mxu1 %v2256_v21  ;;  %v2260_v20 = vld [vmem:[%s3110_s1 + $0x188] sm:$0xff] }
  0x4b   :  { %v2268_v21 = vld [vmem:[%s3110_s1 + $0x1c8] sm:$0xff] }
  0x4c   :  { %1382 = vmatpush.bf16.msra.mxu3 %v2272_v22  ;;  %1431 = vmatpush.bf16.msra.mxu0 %v2280_v23  ;;  %v2252_v22 = vld [vmem:[%s3110_s1 + $0x148] sm:$0xff] }
  0x4d   :  { %v2276_v23 = vld [vmem:[%s3110_s1 + $0x208] sm:$0xff] }
  0x4e   :  { %1334 = vmatpush.bf16.msra.mxu2 %v2263_v36  ;;  %1285 = vmatpush.bf16.msra.mxu1 %v2255_v38  ;;  %v2259_v36 = vld [vmem:[%s3110_s1 + $0x180] sm:$0xff] }
  0x4f   :  { %v2251_v38 = vld [vmem:[%s3110_s1 + $0x140] sm:$0xff] }
  0x50   :  { %1383 = vmatpush.bf16.msra.mxu3 %v2271_v37  ;;  %1432 = vmatpush.bf16.msra.mxu0 %v2279_v39  ;;  %v2267_v37 = vld [vmem:[%s3110_s1 + $0x1c0] sm:$0xff] }
  0x51   :  { %1099 = vmatmul.bf16.gmra.mxu1 %v1606_v32  ;;  %1148 = vmatmul.bf16.gmra.mxu2 %v1610_v33  ;;  %v1750_v32 = vor.u32 %v2184_v24, %v1747_v25  ;;  %v1754_v33 = vor.u32 %v2189_v27, %v1753_v26  ;;  %v2275_v39 = vld [vmem:[%s3110_s1 + $0x200] sm:$0xff]  ;;  %v1586_v24 = vor.u32 %v2141_v14, %v1583_v15 }
  0x52   :  { %1335 = vmatpush.bf16.msra.mxu2 %v2262_v52  ;;  %1286 = vmatpush.bf16.msra.mxu1 %v2254_v54  ;;  %v1798_v52 = vor.u32 %v2199_v47, %v1797_v46  ;;  %v2156_v46 = vld [vmem:[%s3111_s0 + $0x88] sm:$0xf0]  ;;  %v2159_v14 = vld [vmem:[%s3111_s0 + $0xa4] sm:$0xf] }
  0x53   :  { %1197 = vmatmul.bf16.gmra.mxu3 %v1614_v34  ;;  %1246 = vmatmul.bf16.gmra.mxu0 %v1618_v35  ;;  %v1758_v34 = vor.u32 %v2185_v28, %v1755_v29  ;;  %v1762_v35 = vor.u32 %v2190_v31, %v1761_v30 }
  0x54   :  { %1384 = vmatpush.bf16.msra.mxu3 %v2270_v53  ;;  %1433 = vmatpush.bf16.msra.mxu0 %v2278_v55 }
  0x56   :  { %1336 = vmatpush.bf16.msra.mxu2 %v2261_v4  ;;  %1287 = vmatpush.bf16.msra.mxu1 %v2253_v6  ;;  %v1822_v4 = vor.u32 %v2202_v58, %v1819_v59 }
  0x58   :  { %1385 = vmatpush.bf16.msra.mxu3 %v2269_v5  ;;  %1434 = vmatpush.bf16.msra.mxu0 %v2277_v7  ;;  %v1826_v5 = vor.u32 %v2207_v61, %v1825_v60  ;;  %v1830_v7 = vor.u32 %v2203_v62, %v1827_v63 }
  0x5a   :  { %1337 = vmatpush.bf16.msra.mxu2 %v2260_v20  ;;  %1288 = vmatpush.bf16.msra.mxu1 %v2252_v22  ;;  %v1597_v20 = vld [vmem:[%s3111_s0 + $0x20] sm:$0xf] }
  0x5c   :  { %1386 = vmatpush.bf16.msra.mxu3 %v2268_v21  ;;  %1435 = vmatpush.bf16.msra.mxu0 %v2276_v23  ;;  %v2147_v21 = vld [vmem:[%s3111_s0 + $0x40] sm:$0xf0] }
  0x5d   :  { %v1598_v28 = vor.u32 %v2147_v21, %v1597_v20  ;;  %v2165_v20 = vld [vmem:[%s3111_s0 + $0xd0] sm:$0xf0] }
  0x5e   :  { %1338 = vmatpush.bf16.msra.mxu2 %v2259_v36  ;;  %1289 = vmatpush.bf16.msra.mxu1 %v2251_v38  ;;  %v2150_v38 = vld [vmem:[%s3111_s0 + $0x5c] sm:$0xf] }
  0x60   :  { %1387 = vmatpush.bf16.msra.mxu3 %v2267_v37  ;;  %1436 = vmatpush.bf16.msra.mxu0 %v2275_v39  ;;  %v1619_v39 = vld [vmem:[%s3111_s0 + $0x7c] sm:$0xf0] }
  0x61   :  { %1104 = vmatmul.bf16.gmra.mxu1 %v1642_v48  ;;  %1153 = vmatmul.bf16.gmra.mxu2 %v1646_v49  ;;  %v1786_v48 = vor.u32 %v2193_v40, %v1783_v41  ;;  %v1790_v49 = vor.u32 %v2198_v43, %v1789_v42  ;;  %v1625_v41 = vld [vmem:[%s3111_s0 + $0x60] sm:$0xf]  ;;  %v2155_v42 = vld [vmem:[%s3111_s0 + $0x80] sm:$0xf0] }
  0x62   :  { %v2151_v43 = vld [vmem:[%s3111_s0 + $0x64] sm:$0xf] }
  0x63   :  { %1202 = vmatmul.bf16.gmra.mxu3 %v1650_v50  ;;  %1251 = vmatmul.bf16.gmra.mxu0 %v1654_v51  ;;  %v1794_v51 = vor.u32 %v2194_v44, %v1791_v45  ;;  %v1627_v44 = vld [vmem:[%s3111_s0 + $0x84] sm:$0xf0] }
  0x64   :  { %v1633_v45 = vld [vmem:[%s3111_s0 + $0x68] sm:$0xf] }
  0x65   :  { %v1634_v58 = vor.u32 %v2156_v46, %v1633_v45  ;;  %v1697_v45 = vld [vmem:[%s3111_s0 + $0xf0] sm:$0xf]  ;;  %v2173_v46 = vld [vmem:[%s3111_s0 + $0x110] sm:$0xf0] }
  0x71   :  { %1109 = vmatmul.bf16.gmra.mxu1 %v1678_v0  ;;  %1158 = vmatmul.bf16.gmra.mxu2 %v1682_v1  ;;  %v1833_v0 = vld [vmem:[%s3111_s0 + $0x208] sm:$0xf]  ;;  %v2208_v1 = vld [vmem:[%s3111_s0 + $0x228] sm:$0xf0] }
  0x72   :  { %v1834_v8 = vor.u32 %v2208_v1, %v1833_v0 }
  0x73   :  { %1207 = vmatmul.bf16.gmra.mxu3 %v1686_v2  ;;  %1256 = vmatmul.bf16.gmra.mxu0 %v1690_v3 }
  0x81   :  { %1114 = vmatmul.bf16.gmra.mxu1 %v1714_v16  ;;  %1163 = vmatmul.bf16.gmra.mxu2 %v1718_v17  ;;  %v1589_v16 = vld [vmem:[%s3111_s0 + $0x18] sm:$0xf]  ;;  %v2146_v17 = vld [vmem:[%s3111_s0 + $0x38] sm:$0xf0] }
  0x82   :  { %v1590_v25 = vor.u32 %v2146_v17, %v1589_v16  ;;  %v1661_v16 = vld [vmem:[%s3111_s0 + $0xa8] sm:$0xf]  ;;  %v2164_v17 = vld [vmem:[%s3111_s0 + $0xc8] sm:$0xf0] }
  0x83   :  { %1212 = vmatmul.bf16.gmra.mxu3 %v1722_v18  ;;  %1261 = vmatmul.bf16.gmra.mxu0 %v1726_v19  ;;  %v2142_v18 = vld [vmem:[%s3111_s0 + $0x1c] sm:$0xf]  ;;  %v1591_v19 = vld [vmem:[%s3111_s0 + $0x3c] sm:$0xf0] }
  0x84   :  { %v1594_v27 = vor.u32 %v2142_v18, %v1591_v19  ;;  %v1663_v18 = vld [vmem:[%s3111_s0 + $0xcc] sm:$0xf0] }
  0x85   :  { %v1669_v19 = vld [vmem:[%s3111_s0 + $0xb0] sm:$0xf] }
  0x91   :  { %1119 = vmatmul.bf16.gmra.mxu1 %v1750_v32  ;;  %1168 = vmatmul.bf16.gmra.mxu2 %v1754_v33 }
  0x93   :  { %1217 = vmatmul.bf16.gmra.mxu3 %v1758_v34  ;;  %1266 = vmatmul.bf16.gmra.mxu0 %v1762_v35 }
  0x9e   :  { %v2759_v50 = vpop.f32.mrf.mxu1 }
  0xa0   :  { %v1046_v53 = vpop.f32.mrf.mxu0 }
  0xa1   :  { %1124 = vmatmul.bf16.gmra.mxu1 %v1786_v48  ;;  %1173 = vmatmul.bf16.gmra.mxu2 %v1790_v49 }
  0xa3   :  { %1222 = vmatmul.bf16.gmra.mxu3 %v1794_v51  ;;  %1271 = vmatmul.bf16.gmra.mxu0 %v1798_v52  ;;  %v1622_v51 = vor.u32 %v2150_v38, %v1619_v39  ;;  %v1626_v52 = vor.u32 %v2155_v42, %v1625_v41 }
  0xa4   :  { %v2761_v54 = vpop.f32.mrf.mxu2 }
  0xa6   :  { %v2763_v55 = vpop.f32.mrf.mxu3  ;;  %v2765_v56 = vpop.f32.mrf.mxu1 }
  0xa8   :  { %v1048_v57 = vpop.f32.mrf.mxu0 }
  0xac   :  { %v2791_v2 = vpop.f32.mrf.mxu2 }
  0xae   :  { %v2793_v3 = vpop.f32.mrf.mxu3  ;;  %v2795_v6 = vpop.f32.mrf.mxu1 }
  0xb0   :  { %v1051_v9 = vpop.f32.mrf.mxu0 }
  0xb1   :  { %1129 = vmatmul.bf16.gmra.mxu1 %v1822_v4  ;;  %1178 = vmatmul.bf16.gmra.mxu2 %v1826_v5 }
  0xb3   :  { %1227 = vmatmul.bf16.gmra.mxu3 %v1830_v7  ;;  %1276 = vmatmul.bf16.gmra.mxu0 %v1834_v8 }
  0xb4   :  { %v2797_v10 = vpop.f32.mrf.mxu2 }
  0xb6   :  { %v2799_v11 = vpop.f32.mrf.mxu3  ;;  %v2801_v12 = vpop.f32.mrf.mxu1 }
  0xb8   :  { %v1053_v13 = vpop.f32.mrf.mxu0 }
  0xbc   :  { %v2827_v22 = vpop.f32.mrf.mxu2 }
  0xbe   :  { %v2829_v23 = vpop.f32.mrf.mxu3  ;;  %v1095_v26 = vpop.f32.mrf.mxu1 }
  0xbf   :  { %v1096_v29 = vadd.f32 %v1095_v26, %v1046_v53 }
  0xc0   :  { %v1242_v30 = vpop.f32.mrf.mxu0 }
  0xc1   :  { %1290 = vmatmul.bf16.vlgmr.msra.gmra.mxu1 %v1586_v24  ;;  %1339 = vmatmul.bf16.vlgmr.msra.gmra.mxu2 %v1590_v25 }
  0xc3   :  { %1388 = vmatmul.bf16.vlgmr.msra.gmra.mxu3 %v1594_v27  ;;  %1437 = vmatmul.bf16.vlgmr.msra.gmra.mxu0 %v1598_v28  ;;  %v1662_v27 = vor.u32 %v2164_v17, %v1661_v16 }
  0xc4   :  { %v1144_v31 = vpop.f32.mrf.mxu2 }
  0xc5   :  { %v1145_v32 = vadd.f32 %v1144_v31, %v1096_v29 }
  0xc6   :  { %v1193_v33 = vpop.f32.mrf.mxu3  ;;  %v1097_v34 = vpop.f32.mrf.mxu1 }
  0xc7   :  { %v1194_v35 = vadd.f32 %v1193_v33, %v1145_v32  ;;  %v1098_v36 = vadd.f32 %v1097_v34, %v1048_v57  ;;  %v1630_v57 = vor.u32 %v2151_v43, %v1627_v44  ;;  %v2168_v43 = vld [vmem:[%s3111_s0 + $0xec] sm:$0xf] }
  0xc8   :  { %v1244_v37 = vpop.f32.mrf.mxu0 }
  0xc9   :  { %v2837_v40 = vadd.f32 %v1242_v30, %v1194_v35  ;;  %v1670_v30 = vor.u32 %v2165_v20, %v1669_v19  ;;  %v1733_v19 = vld [vmem:[%s3111_s0 + $0x138] sm:$0xf]  ;;  %v2182_v20 = vld [vmem:[%s3111_s0 + $0x158] sm:$0xf0] }
  0xcc   :  { %v1146_v47 = vpop.f32.mrf.mxu2 }
  0xcd   :  { %v1147_v48 = vadd.f32 %v1146_v47, %v1098_v36  ;;  %v1699_v47 = vld [vmem:[%s3111_s0 + $0x114] sm:$0xf0] }
  0xce   :  { %v1195_v49 = vpop.f32.mrf.mxu3  ;;  %v1100_v53 = vpop.f32.mrf.mxu1 }
  0xcf   :  { %v1196_v59 = vadd.f32 %v1195_v49, %v1147_v48  ;;  %v1101_v60 = vadd.f32 %v1100_v53, %v1051_v9  ;;  %v1655_v9 = vld [vmem:[%s3111_s0 + $0xc4] sm:$0xf0]  ;;  %v1705_v48 = vld [vmem:[%s3111_s0 + $0xf8] sm:$0xf]  ;;  %v2174_v49 = vld [vmem:[%s3111_s0 + $0x118] sm:$0xf0] }
  0xd0   :  { %v1247_v61 = vpop.f32.mrf.mxu0  ;;  %v1658_v26 = vor.u32 %v2159_v14, %v1655_v9 }
  0xd1   :  { %1295 = vmatmul.bf16.gmra.mxu1 %v1622_v51  ;;  %1344 = vmatmul.bf16.gmra.mxu2 %v1626_v52  ;;  %v2857_v62 = vadd.f32 %v1244_v37, %v1196_v59 }
  0xd3   :  { %1393 = vmatmul.bf16.gmra.mxu3 %v1630_v57  ;;  %1442 = vmatmul.bf16.gmra.mxu0 %v1634_v58  ;;  %v1698_v58 = vor.u32 %v2173_v46, %v1697_v45  ;;  %v2186_v46 = vld [vmem:[%s3111_s0 + $0x17c] sm:$0xf] }
  0xd4   :  { %v1149_v63 = vpop.f32.mrf.mxu2 }
  0xd5   :  { %v1150_v0 = vadd.f32 %v1149_v63, %v1101_v60 }
  0xd6   :  { %v1198_v1 = vpop.f32.mrf.mxu3  ;;  %v1102_v4 = vpop.f32.mrf.mxu1 }
  0xd7   :  { %v1199_v5 = vadd.f32 %v1198_v1, %v1150_v0  ;;  %v1103_v7 = vadd.f32 %v1102_v4, %v1053_v13  ;;  %v2160_v13 = vld [vmem:[%s3111_s0 + $0xac] sm:$0xf] }
  0xd8   :  { %v1249_v8 = vpop.f32.mrf.mxu0  ;;  %v1666_v29 = vor.u32 %v2160_v13, %v1663_v18  ;;  %v2177_v13 = vld [vmem:[%s3111_s0 + $0x134] sm:$0xf] }
  0xd9   :  { %v2865_v15 = vadd.f32 %v1247_v61, %v1199_v5  ;;  %v1706_v61 = vor.u32 %v2174_v49, %v1705_v48  ;;  %v2191_v48 = vld [vmem:[%s3111_s0 + $0x1a0] sm:$0xf0] }
  0xda   :  { %v2187_v49 = vld [vmem:[%s3111_s0 + $0x184] sm:$0xf] }
  0xdc   :  { %v1151_v21 = vpop.f32.mrf.mxu2 }
  0xdd   :  { %v1152_v24 = vadd.f32 %v1151_v21, %v1103_v7  ;;  %v1735_v21 = vld [vmem:[%s3111_s0 + $0x15c] sm:$0xf0] }
  0xde   :  { %v1200_v25 = vpop.f32.mrf.mxu3  ;;  %v1105_v28 = vpop.f32.mrf.mxu1 }
  0xdf   :  { %v1201_v31 = vadd.f32 %v1200_v25, %v1152_v24  ;;  %v1106_v32 = vadd.f32 %v1105_v28, %v2759_v50  ;;  %v1691_v50 = vld [vmem:[%s3111_s0 + $0x10c] sm:$0xf0]  ;;  %v1741_v24 = vld [vmem:[%s3111_s0 + $0x140] sm:$0xf]  ;;  %v2183_v25 = vld [vmem:[%s3111_s0 + $0x160] sm:$0xf0] }
  0xe0   :  { %v1252_v33 = vpop.f32.mrf.mxu0  ;;  %v1694_v57 = vor.u32 %v2168_v43, %v1691_v50 }
  0xe1   :  { %1300 = vmatmul.bf16.gmra.mxu1 %v1658_v26  ;;  %1349 = vmatmul.bf16.gmra.mxu2 %v1662_v27  ;;  %v2886_v34 = vadd.f32 %v1249_v8, %v1201_v31 }
  0xe3   :  { %1398 = vmatmul.bf16.gmra.mxu3 %v1666_v29  ;;  %1447 = vmatmul.bf16.gmra.mxu0 %v1670_v30  ;;  %v1734_v30 = vor.u32 %v2182_v20, %v1733_v19  ;;  %v2195_v20 = vld [vmem:[%s3111_s0 + $0x1c4] sm:$0xf] }
  0xe4   :  { %v1154_v35 = vpop.f32.mrf.mxu2 }
  0xe5   :  { %v1155_v36 = vadd.f32 %v1154_v35, %v1106_v32 }
  0xe6   :  { %v1203_v37 = vpop.f32.mrf.mxu3  ;;  %v1107_v38 = vpop.f32.mrf.mxu1 }
  0xe7   :  { %v1204_v39 = vadd.f32 %v1203_v37, %v1155_v36  ;;  %v1108_v41 = vadd.f32 %v1107_v38, %v2765_v56  ;;  %v2169_v56 = vld [vmem:[%s3111_s0 + $0xf4] sm:$0xf] }
  0xe8   :  { %v1254_v42 = vpop.f32.mrf.mxu0  ;;  %v1702_v60 = vor.u32 %v2169_v56, %v1699_v47  ;;  %v1763_v56 = vld [vmem:[%s3111_s0 + $0x19c] sm:$0xf0] }
  0xe9   :  { %v2895_v44 = vadd.f32 %v1252_v33, %v1204_v39  ;;  %v1742_v33 = vor.u32 %v2183_v25, %v1741_v24  ;;  %v2200_v24 = vld [vmem:[%s3111_s0 + $0x1e8] sm:$0xf0] }
  0xea   :  { %v2196_v25 = vld [vmem:[%s3111_s0 + $0x1cc] sm:$0xf] }
  0xec   :  { %v1156_v51 = vpop.f32.mrf.mxu2 }
  0xed   :  { %v1157_v52 = vadd.f32 %v1156_v51, %v1108_v41 }
  0xee   :  { %v1205_v53 = vpop.f32.mrf.mxu3  ;;  %v1110_v59 = vpop.f32.mrf.mxu1 }
  0xef   :  { %v1206_v63 = vadd.f32 %v1205_v53, %v1157_v52  ;;  %v1111_v0 = vadd.f32 %v1110_v59, %v2795_v6  ;;  %v1727_v6 = vld [vmem:[%s3111_s0 + $0x154] sm:$0xf0]  ;;  %v1771_v52 = vld [vmem:[%s3111_s0 + $0x1a4] sm:$0xf0] }
  0xf0   :  { %v1257_v1 = vpop.f32.mrf.mxu0  ;;  %v1730_v29 = vor.u32 %v2177_v13, %v1727_v6  ;;  %v1777_v53 = vld [vmem:[%s3111_s0 + $0x188] sm:$0xf] }
  0xf1   :  { %1305 = vmatmul.bf16.gmra.mxu1 %v1694_v57  ;;  %1354 = vmatmul.bf16.gmra.mxu2 %v1698_v58  ;;  %v2916_v4 = vadd.f32 %v1254_v42, %v1206_v63  ;;  %v2192_v57 = vld [vmem:[%s3111_s0 + $0x1a8] sm:$0xf0] }
  0xf3   :  { %1403 = vmatmul.bf16.gmra.mxu3 %v1702_v60  ;;  %1452 = vmatmul.bf16.gmra.mxu0 %v1706_v61  ;;  %v1766_v61 = vor.u32 %v2186_v46, %v1763_v56 }
  0xf4   :  { %v1159_v5 = vpop.f32.mrf.mxu2 }
  0xf5   :  { %v1160_v7 = vadd.f32 %v1159_v5, %v1111_v0 }
  0xf6   :  { %v1208_v8 = vpop.f32.mrf.mxu3  ;;  %v1112_v14 = vpop.f32.mrf.mxu1 }
  0xf7   :  { %v1209_v9 = vadd.f32 %v1208_v8, %v1160_v7  ;;  %v1113_v16 = vadd.f32 %v1112_v14, %v2801_v12  ;;  %v2178_v12 = vld [vmem:[%s3111_s0 + $0x13c] sm:$0xf] }
  0xf8   :  { %v1259_v17 = vpop.f32.mrf.mxu0  ;;  %v1738_v32 = vor.u32 %v2178_v12, %v1735_v21  ;;  %v1799_v12 = vld [vmem:[%s3111_s0 + $0x1e4] sm:$0xf0] }
  0xf9   :  { %v2925_v18 = vadd.f32 %v1257_v1, %v1209_v9  ;;  %v1774_v1 = vor.u32 %v2187_v49, %v1771_v52  ;;  %v2204_v49 = vld [vmem:[%s3111_s0 + $0x20c] sm:$0xf] }
  0xfc   :  { %v1161_v26 = vpop.f32.mrf.mxu2 }
  0xfd   :  { %v1162_v27 = vadd.f32 %v1161_v26, %v1113_v16 }
  0xfe   :  { %v1210_v28 = vpop.f32.mrf.mxu3  ;;  %v1115_v31 = vpop.f32.mrf.mxu1 }
  0xff   :  { %v1211_v35 = vadd.f32 %v1210_v28, %v1162_v27  ;;  %v1116_v38 = vadd.f32 %v1115_v31, %v2761_v54  ;;  %v1769_v54 = vld [vmem:[%s3111_s0 + $0x180] sm:$0xf]  ;;  %v1807_v27 = vld [vmem:[%s3111_s0 + $0x1ec] sm:$0xf0] }
 0x100   :  { %v1262_v36 = vpop.f32.mrf.mxu0  ;;  %v1770_v63 = vor.u32 %v2191_v48, %v1769_v54  ;;  %v1813_v28 = vld [vmem:[%s3111_s0 + $0x1d0] sm:$0xf] }
 0x101   :  { %1310 = vmatmul.bf16.gmra.mxu1 %v1730_v29  ;;  %1359 = vmatmul.bf16.gmra.mxu2 %v1734_v30  ;;  %v2945_v37 = vadd.f32 %v1259_v17, %v1211_v35  ;;  %v2201_v29 = vld [vmem:[%s3111_s0 + $0x1f0] sm:$0xf0] }
 0x103   :  { %1408 = vmatmul.bf16.gmra.mxu3 %v1738_v32  ;;  %1457 = vmatmul.bf16.gmra.mxu0 %v1742_v33  ;;  %v1802_v33 = vor.u32 %v2195_v20, %v1799_v12 }
 0x104   :  { %v1164_v39 = vpop.f32.mrf.mxu2 }
 0x105   :  { %v1165_v41 = vadd.f32 %v1164_v39, %v1116_v38  ;;  %v1810_v38 = vor.u32 %v2196_v25, %v1807_v27 }
 0x106   :  { %v1213_v42 = vpop.f32.mrf.mxu3  ;;  %v1117_v43 = vpop.f32.mrf.mxu1 }
 0x107   :  { %v1214_v50 = vadd.f32 %v1213_v42, %v1165_v41  ;;  %v1118_v51 = vadd.f32 %v1117_v43, %v2791_v2  ;;  %v1778_v2 = vor.u32 %v2192_v57, %v1777_v53  ;;  %v2209_v53 = vld [vmem:[%s3111_s0 + $0x230] sm:$0xf0] }
 0x108   :  { %v1264_v45 = vpop.f32.mrf.mxu0  ;;  %v2205_v57 = vld [vmem:[%s3111_s0 + $0x214] sm:$0xf] }
 0x109   :  { %v2954_v47 = vadd.f32 %v1262_v36, %v1214_v50 }
 0x10c   :  { %v1166_v58 = vpop.f32.mrf.mxu2 }
 0x10d   :  { %v1167_v59 = vadd.f32 %v1166_v58, %v1118_v51  ;;  %v1835_v51 = vld [vmem:[%s3111_s0 + $0x22c] sm:$0xf0] }
 0x10e   :  { %v1215_v60 = vpop.f32.mrf.mxu3  ;;  %v1120_v0 = vpop.f32.mrf.mxu1 }
 0x10f   :  { %v1216_v5 = vadd.f32 %v1215_v60, %v1167_v59  ;;  %v1121_v14 = vadd.f32 %v1120_v0, %v2797_v10  ;;  %v1805_v10 = vld [vmem:[%s3111_s0 + $0x1c8] sm:$0xf]  ;;  %v1843_v59 = vld [vmem:[%s3111_s0 + $0x234] sm:$0xf0] }
 0x110   :  { %v1267_v7 = vpop.f32.mrf.mxu0  ;;  %v1806_v35 = vor.u32 %v2200_v24, %v1805_v10  ;;  %v1849_v60 = vld [vmem:[%s3111_s0 + $0x218] sm:$0xf] }
 0x111   :  { %1315 = vmatmul.bf16.gmra.mxu1 %v1766_v61  ;;  %1364 = vmatmul.bf16.gmra.mxu2 %v1770_v63  ;;  %v2975_v8 = vadd.f32 %v1264_v45, %v1216_v5  ;;  %v2210_v61 = vld [vmem:[%s3111_s0 + $0x238] sm:$0xf0] }
 0x113   :  { %1413 = vmatmul.bf16.gmra.mxu3 %v1774_v1  ;;  %1462 = vmatmul.bf16.gmra.mxu0 %v1778_v2  ;;  %v1838_v2 = vor.u32 %v2204_v49, %v1835_v51 }
 0x114   :  { %v1169_v9 = vpop.f32.mrf.mxu2 }
 0x115   :  { %v1170_v16 = vadd.f32 %v1169_v9, %v1121_v14  ;;  %v1846_v14 = vor.u32 %v2205_v57, %v1843_v59 }
 0x116   :  { %v1218_v17 = vpop.f32.mrf.mxu3  ;;  %v1122_v13 = vpop.f32.mrf.mxu1 }
 0x117   :  { %v1219_v6 = vadd.f32 %v1218_v17, %v1170_v16  ;;  %v1123_v26 = vadd.f32 %v1122_v13, %v2827_v22  ;;  %v1814_v22 = vor.u32 %v2201_v29, %v1813_v28 }
 0x118   :  { %v1269_v19 = vpop.f32.mrf.mxu0 }
 0x119   :  { %v2984_v21 = vadd.f32 %v1267_v7, %v1219_v6 }
 0x11c   :  { %v1171_v30 = vpop.f32.mrf.mxu2 }
 0x11d   :  { %v1172_v31 = vadd.f32 %v1171_v30, %v1123_v26 }
 0x11e   :  { %v1220_v32 = vpop.f32.mrf.mxu3  ;;  %v1125_v36 = vpop.f32.mrf.mxu1 }
 0x11f   :  { %v1221_v39 = vadd.f32 %v1220_v32, %v1172_v31  ;;  %v1126_v43 = vadd.f32 %v1125_v36, %v2763_v55  ;;  %v1841_v55 = vld [vmem:[%s3111_s0 + $0x210] sm:$0xf] }
 0x120   :  { %v1272_v41 = vpop.f32.mrf.mxu0  ;;  %v1842_v5 = vor.u32 %v2209_v53, %v1841_v55 }
 0x121   :  { %1320 = vmatmul.bf16.gmra.mxu1 %v1802_v33  ;;  %1369 = vmatmul.bf16.gmra.mxu2 %v1806_v35  ;;  %v3005_v42 = vadd.f32 %v1269_v19, %v1221_v39 }
 0x123   :  { %1418 = vmatmul.bf16.gmra.mxu3 %v1810_v38  ;;  %1467 = vmatmul.bf16.gmra.mxu0 %v1814_v22 }
 0x124   :  { %v1174_v50 = vpop.f32.mrf.mxu2 }
 0x125   :  { %v1175_v45 = vadd.f32 %v1174_v50, %v1126_v43 }
 0x126   :  { %v1223_v46 = vpop.f32.mrf.mxu3  ;;  %v1127_v56 = vpop.f32.mrf.mxu1 }
 0x127   :  { %v1224_v54 = vadd.f32 %v1223_v46, %v1175_v45  ;;  %v1128_v58 = vadd.f32 %v1127_v56, %v2793_v3  ;;  %v1850_v3 = vor.u32 %v2210_v61, %v1849_v60 }
 0x128   :  { %v1274_v48 = vpop.f32.mrf.mxu0 }
 0x129   :  { %v3014_v52 = vadd.f32 %v1272_v41, %v1224_v54 }
 0x12c   :  { %v1176_v63 = vpop.f32.mrf.mxu2 }
 0x12d   :  { %v1177_v0 = vadd.f32 %v1176_v63, %v1128_v58 }
 0x12e   :  { %v1225_v1 = vpop.f32.mrf.mxu3  ;;  %v1130_v7 = vpop.f32.mrf.mxu1 }
 0x12f   :  { %v1226_v9 = vadd.f32 %v1225_v1, %v1177_v0  ;;  %v1131_v13 = vadd.f32 %v1130_v7, %v2799_v11 }
 0x130   :  { %v1277_v16 = vpop.f32.mrf.mxu0 }
 0x131   :  { %1325 = vmatmul.bf16.gmra.mxu1 %v1838_v2  ;;  %1374 = vmatmul.bf16.gmra.mxu2 %v1842_v5  ;;  %v3035_v17 = vadd.f32 %v1274_v48, %v1226_v9 }
 0x133   :  { %1423 = vmatmul.bf16.gmra.mxu3 %v1846_v14  ;;  %1472 = vmatmul.bf16.gmra.mxu0 %v1850_v3 }
 0x134   :  { %v1179_v6 = vpop.f32.mrf.mxu2 }
 0x135   :  { %v1180_v19 = vadd.f32 %v1179_v6, %v1131_v13 }
 0x136   :  { %v1228_v20 = vpop.f32.mrf.mxu3  ;;  %v1132_v12 = vpop.f32.mrf.mxu1 }
 0x137   :  { %v1229_v10 = vadd.f32 %v1228_v20, %v1180_v19  ;;  %v1133_v26 = vadd.f32 %v1132_v12, %v2829_v23 }
 0x138   :  { %v1279_v24 = vpop.f32.mrf.mxu0 }
 0x139   :  { %v3038_v25 = vadd.f32 %v1277_v16, %v1229_v10 }
 0x13c   :  { %v1181_v27 = vpop.f32.mrf.mxu2 }
 0x13d   :  { %v1182_v28 = vadd.f32 %v1181_v27, %v1133_v26 }
 0x13e   :  { %v1230_v29 = vpop.f32.mrf.mxu3  ;;  %v1291_v30 = vpop.f32.mrf.mxu1 }
 0x13f   :  { %v1231_v31 = vadd.f32 %v1230_v29, %v1182_v28  ;;  %v1292_v11 = vadd.f32 %v1291_v30, %v2837_v40 }
 0x140   :  { %v1438_v32 = vpop.f32.mrf.mxu0 }
 0x141   :  { %v3041_v33 = vadd.f32 %v1279_v24, %v1231_v31 }
 0x144   :  { %v1340_v35 = vpop.f32.mrf.mxu2 }
 0x145   :  { %v1341_v36 = vadd.f32 %v1340_v35, %v1292_v11 }
 0x146   :  { %v1389_v38 = vpop.f32.mrf.mxu3  ;;  %v1293_v22 = vpop.f32.mrf.mxu1 }
 0x147   :  { %v1390_v39 = vadd.f32 %v1389_v38, %v1341_v36  ;;  %v1294_v23 = vadd.f32 %v1293_v22, %v2857_v62 }
 0x148   :  { %v1440_v41 = vpop.f32.mrf.mxu0 }
 0x149   :  { %v1439_v43 = vadd.f32 %v1438_v32, %v1390_v39 }
 0x14b   :  { %1478 = vst [vmem:[%s3112_s2] sm:$0xff] %v1439_v43  ;;  %v1515_v49 = vmul.f32 %v1439_v43, %v1439_v43 }
 0x14c   :  { %v1342_v50 = vpop.f32.mrf.mxu2 }
 0x14d   :  { %v1343_v45 = vadd.f32 %v1342_v50, %v1294_v23 }
 0x14e   :  { %v1391_v46 = vpop.f32.mrf.mxu3  ;;  %v1296_v56 = vpop.f32.mrf.mxu1 }
 0x14f   :  { %v1392_v54 = vadd.f32 %v1391_v46, %v1343_v45  ;;  %v1297_v53 = vadd.f32 %v1296_v56, %v2865_v15 }
 0x150   :  { %v1443_v48 = vpop.f32.mrf.mxu0 }
 0x151   :  { %v1441_v40 = vadd.f32 %v1440_v41, %v1392_v54 }
 0x153   :  { %1479 = vst [vmem:[%s3112_s2 + $0x8] sm:$0xff] %v1441_v40  ;;  %v1494_v51 = vadd.f32 %v1441_v40, %v1439_v43  ;;  %v1516_v55 = vmul.f32 %v1441_v40, %v1441_v40 }
 0x154   :  { %v1345_v57 = vpop.f32.mrf.mxu2 }
 0x155   :  { %v1531_v58 = vadd.f32 %v1516_v55, %v1515_v49  ;;  %v1346_v59 = vadd.f32 %v1345_v57, %v1297_v53 }
 0x156   :  { %v1394_v62 = vpop.f32.mrf.mxu3  ;;  %v1298_v60 = vpop.f32.mrf.mxu1 }
 0x157   :  { %v1395_v61 = vadd.f32 %v1394_v62, %v1346_v59  ;;  %v1299_v5 = vadd.f32 %v1298_v60, %v2886_v34 }
 0x158   :  { %v1445_v63 = vpop.f32.mrf.mxu0 }
 0x159   :  { %v1444_v0 = vadd.f32 %v1443_v48, %v1395_v61 }
 0x15b   :  { %1480 = vst [vmem:[%s3112_s2 + $0x10] sm:$0xff] %v1444_v0  ;;  %v1495_v1 = vadd.f32 %v1494_v51, %v1444_v0  ;;  %v1517_v2 = vmul.f32 %v1444_v0, %v1444_v0 }
 0x15c   :  { %v1347_v7 = vpop.f32.mrf.mxu2 }
 0x15d   :  { %v1532_v14 = vadd.f32 %v1531_v58, %v1517_v2  ;;  %v1348_v3 = vadd.f32 %v1347_v7, %v1299_v5 }
 0x15e   :  { %v1396_v15 = vpop.f32.mrf.mxu3  ;;  %v1301_v9 = vpop.f32.mrf.mxu1 }
 0x15f   :  { %v1397_v16 = vadd.f32 %v1396_v15, %v1348_v3  ;;  %v1302_v12 = vadd.f32 %v1301_v9, %v2895_v44 }
 0x160   :  { %v1448_v13 = vpop.f32.mrf.mxu0 }
 0x161   :  { %v1446_v6 = vadd.f32 %v1445_v63, %v1397_v16 }
 0x163   :  { %1481 = vst [vmem:[%s3112_s2 + $0x18] sm:$0xff] %v1446_v6  ;;  %v1496_v19 = vadd.f32 %v1495_v1, %v1446_v6  ;;  %v1518_v20 = vmul.f32 %v1446_v6, %v1446_v6 }
 0x164   :  { %v1350_v10 = vpop.f32.mrf.mxu2 }
 0x165   :  { %v1533_v24 = vadd.f32 %v1532_v14, %v1518_v20  ;;  %v1351_v26 = vadd.f32 %v1350_v10, %v1302_v12 }
 0x166   :  { %v1399_v34 = vpop.f32.mrf.mxu3  ;;  %v1303_v27 = vpop.f32.mrf.mxu1 }
 0x167   :  { %v1400_v28 = vadd.f32 %v1399_v34, %v1351_v26  ;;  %v1304_v11 = vadd.f32 %v1303_v27, %v2916_v4 }
 0x168   :  { %v1450_v29 = vpop.f32.mrf.mxu0 }
 0x169   :  { %v1449_v30 = vadd.f32 %v1448_v13, %v1400_v28 }
 0x16b   :  { %1482 = vst [vmem:[%s3112_s2 + $0x20] sm:$0xff] %v1449_v30  ;;  %v1497_v31 = vadd.f32 %v1496_v19, %v1449_v30  ;;  %v1519_v32 = vmul.f32 %v1449_v30, %v1449_v30 }
 0x16c   :  { %v1352_v35 = vpop.f32.mrf.mxu2 }
 0x16d   :  { %v1534_v36 = vadd.f32 %v1533_v24, %v1519_v32  ;;  %v1353_v38 = vadd.f32 %v1352_v35, %v1304_v11 }
 0x16e   :  { %v1401_v44 = vpop.f32.mrf.mxu3  ;;  %v1306_v22 = vpop.f32.mrf.mxu1 }
 0x16f   :  { %v1402_v39 = vadd.f32 %v1401_v44, %v1353_v38  ;;  %v1307_v45 = vadd.f32 %v1306_v22, %v2925_v18 }
 0x170   :  { %v1453_v41 = vpop.f32.mrf.mxu0 }
 0x171   :  { %v1451_v43 = vadd.f32 %v1450_v29, %v1402_v39 }
 0x173   :  { %1483 = vst [vmem:[%s3112_s2 + $0x28] sm:$0xff] %v1451_v43  ;;  %v1498_v23 = vadd.f32 %v1497_v31, %v1451_v43  ;;  %v1520_v50 = vmul.f32 %v1451_v43, %v1451_v43 }
 0x174   :  { %v1355_v46 = vpop.f32.mrf.mxu2 }
 0x175   :  { %v1535_v56 = vadd.f32 %v1534_v36, %v1520_v50  ;;  %v1356_v54 = vadd.f32 %v1355_v46, %v1307_v45 }
 0x176   :  { %v1404_v4 = vpop.f32.mrf.mxu3  ;;  %v1308_v48 = vpop.f32.mrf.mxu1 }
 0x177   :  { %v1405_v40 = vadd.f32 %v1404_v4, %v1356_v54  ;;  %v1309_v57 = vadd.f32 %v1308_v48, %v2945_v37 }
 0x178   :  { %v1455_v49 = vpop.f32.mrf.mxu0 }
 0x179   :  { %v1454_v51 = vadd.f32 %v1453_v41, %v1405_v40 }
 0x17b   :  { %1484 = vst [vmem:[%s3112_s2 + $0x30] sm:$0xff] %v1454_v51  ;;  %v1499_v55 = vadd.f32 %v1498_v23, %v1454_v51  ;;  %v1521_v53 = vmul.f32 %v1454_v51, %v1454_v51 }
 0x17c   :  { %v1357_v58 = vpop.f32.mrf.mxu2 }
 0x17d   :  { %v1536_v59 = vadd.f32 %v1535_v56, %v1521_v53  ;;  %v1358_v62 = vadd.f32 %v1357_v58, %v1309_v57 }
 0x17e   :  { %v1406_v18 = vpop.f32.mrf.mxu3  ;;  %v1311_v60 = vpop.f32.mrf.mxu1 }
 0x17f   :  { %v1407_v61 = vadd.f32 %v1406_v18, %v1358_v62  ;;  %v1312_v5 = vadd.f32 %v1311_v60, %v2954_v47 }
 0x180   :  { %v1458_v63 = vpop.f32.mrf.mxu0 }
 0x181   :  { %v1456_v0 = vadd.f32 %v1455_v49, %v1407_v61 }
 0x183   :  { %1485 = vst [vmem:[%s3112_s2 + $0x38] sm:$0xff] %v1456_v0  ;;  %v1500_v1 = vadd.f32 %v1499_v55, %v1456_v0  ;;  %v1522_v2 = vmul.f32 %v1456_v0, %v1456_v0 }
 0x184   :  { %v1360_v7 = vpop.f32.mrf.mxu2 }
 0x185   :  { %v1537_v14 = vadd.f32 %v1536_v59, %v1522_v2  ;;  %v1361_v3 = vadd.f32 %v1360_v7, %v1312_v5 }
 0x186   :  { %v1409_v37 = vpop.f32.mrf.mxu3  ;;  %v1313_v15 = vpop.f32.mrf.mxu1 }
 0x187   :  { %v1410_v9 = vadd.f32 %v1409_v37, %v1361_v3  ;;  %v1314_v20 = vadd.f32 %v1313_v15, %v2975_v8 }
 0x188   :  { %v1460_v16 = vpop.f32.mrf.mxu0 }
 0x189   :  { %v1459_v13 = vadd.f32 %v1458_v63, %v1410_v9 }
 0x18b   :  { %1486 = vst [vmem:[%s3112_s2 + $0x40] sm:$0xff] %v1459_v13  ;;  %v1501_v6 = vadd.f32 %v1500_v1, %v1459_v13  ;;  %v1523_v19 = vmul.f32 %v1459_v13, %v1459_v13 }
 0x18c   :  { %v1362_v12 = vpop.f32.mrf.mxu2 }
 0x18d   :  { %v1538_v10 = vadd.f32 %v1537_v14, %v1523_v19  ;;  %v1363_v24 = vadd.f32 %v1362_v12, %v1314_v20 }
 0x18e   :  { %v1411_v47 = vpop.f32.mrf.mxu3  ;;  %v1316_v26 = vpop.f32.mrf.mxu1 }
 0x18f   :  { %v1412_v34 = vadd.f32 %v1411_v47, %v1363_v24  ;;  %v1317_v31 = vadd.f32 %v1316_v26, %v2984_v21 }
 0x190   :  { %v1463_v27 = vpop.f32.mrf.mxu0 }
 0x191   :  { %v1461_v28 = vadd.f32 %v1460_v16, %v1412_v34 }
 0x193   :  { %1487 = vst [vmem:[%s3112_s2 + $0x48] sm:$0xff] %v1461_v28  ;;  %v1502_v29 = vadd.f32 %v1501_v6, %v1461_v28  ;;  %v1524_v30 = vmul.f32 %v1461_v28, %v1461_v28 }
 0x194   :  { %v1365_v32 = vpop.f32.mrf.mxu2 }
 0x195   :  { %v1539_v11 = vadd.f32 %v1538_v10, %v1524_v30  ;;  %v1366_v35 = vadd.f32 %v1365_v32, %v1317_v31 }
 0x196   :  { %v1414_v8 = vpop.f32.mrf.mxu3  ;;  %v1318_v36 = vpop.f32.mrf.mxu1 }
 0x197   :  { %v1415_v38 = vadd.f32 %v1414_v8, %v1366_v35  ;;  %v1319_v43 = vadd.f32 %v1318_v36, %v3005_v42 }
 0x198   :  { %v1465_v44 = vpop.f32.mrf.mxu0 }
 0x199   :  { %v1464_v22 = vadd.f32 %v1463_v27, %v1415_v38 }
 0x19b   :  { %1488 = vst [vmem:[%s3112_s2 + $0x50] sm:$0xff] %v1464_v22  ;;  %v1503_v39 = vadd.f32 %v1502_v29, %v1464_v22  ;;  %v1525_v41 = vmul.f32 %v1464_v22, %v1464_v22 }
 0x19c   :  { %v1367_v23 = vpop.f32.mrf.mxu2 }
 0x19d   :  { %v1540_v50 = vadd.f32 %v1539_v11, %v1525_v41  ;;  %v1368_v45 = vadd.f32 %v1367_v23, %v1319_v43 }
 0x19e   :  { %v1416_v21 = vpop.f32.mrf.mxu3  ;;  %v1321_v46 = vpop.f32.mrf.mxu1 }
 0x19f   :  { %v1417_v56 = vadd.f32 %v1416_v21, %v1368_v45  ;;  %v1322_v49 = vadd.f32 %v1321_v46, %v3014_v52 }
 0x1a0   :  { %v1468_v4 = vpop.f32.mrf.mxu0 }
 0x1a1   :  { %v1466_v54 = vadd.f32 %v1465_v44, %v1417_v56 }
 0x1a3   :  { %1489 = vst [vmem:[%s3112_s2 + $0x58] sm:$0xff] %v1466_v54  ;;  %v1504_v48 = vadd.f32 %v1503_v39, %v1466_v54  ;;  %v1526_v40 = vmul.f32 %v1466_v54, %v1466_v54 }
 0x1a4   :  { %v1370_v51 = vpop.f32.mrf.mxu2 }
 0x1a5   :  { %v1541_v55 = vadd.f32 %v1540_v50, %v1526_v40  ;;  %v1371_v53 = vadd.f32 %v1370_v51, %v1322_v49 }
 0x1a6   :  { %v1419_v42 = vpop.f32.mrf.mxu3  ;;  %v1323_v57 = vpop.f32.mrf.mxu1 }
 0x1a7   :  { %v1420_v58 = vadd.f32 %v1419_v42, %v1371_v53  ;;  %v1324_v60 = vadd.f32 %v1323_v57, %v3035_v17 }
 0x1a8   :  { %v1470_v61 = vpop.f32.mrf.mxu0 }
 0x1a9   :  { %v1469_v59 = vadd.f32 %v1468_v4, %v1420_v58 }
 0x1ab   :  { %1490 = vst [vmem:[%s3112_s2 + $0x60] sm:$0xff] %v1469_v59  ;;  %v1505_v62 = vadd.f32 %v1504_v48, %v1469_v59  ;;  %v1527_v18 = vmul.f32 %v1469_v59, %v1469_v59 }
 0x1ac   :  { %v1372_v63 = vpop.f32.mrf.mxu2 }
 0x1ad   :  { %v1542_v0 = vadd.f32 %v1541_v55, %v1527_v18  ;;  %v1373_v1 = vadd.f32 %v1372_v63, %v1324_v60 }
 0x1ae   :  { %v1421_v52 = vpop.f32.mrf.mxu3  ;;  %v1326_v2 = vpop.f32.mrf.mxu1 }
 0x1af   :  { %v1422_v5 = vadd.f32 %v1421_v52, %v1373_v1  ;;  %v1327_v37 = vadd.f32 %v1326_v2, %v3038_v25 }
 0x1b0   :  { %v1473_v13 = vpop.f32.mrf.mxu0 }
 0x1b1   :  { %v1471_v7 = vadd.f32 %v1470_v61, %v1422_v5 }
 0x1b3   :  { %1491 = vst [vmem:[%s3112_s2 + $0x68] sm:$0xff] %v1471_v7  ;;  %v1506_v14 = vadd.f32 %v1505_v62, %v1471_v7  ;;  %v1528_v3 = vmul.f32 %v1471_v7, %v1471_v7 }
 0x1b4   :  { %v1375_v15 = vpop.f32.mrf.mxu2 }
 0x1b5   :  { %v1543_v9 = vadd.f32 %v1542_v0, %v1528_v3  ;;  %v1376_v16 = vadd.f32 %v1375_v15, %v1327_v37 }
 0x1b6   :  { %v1424_v17 = vpop.f32.mrf.mxu3  ;;  %v1328_v19 = vpop.f32.mrf.mxu1 }
 0x1b7   :  { %v1425_v6 = vadd.f32 %v1424_v17, %v1376_v16  ;;  %v1329_v24 = vadd.f32 %v1328_v19, %v3041_v33 }
 0x1b8   :  { %v1475_v28 = vpop.f32.mrf.mxu0 }
 0x1b9   :  { %v1474_v20 = vadd.f32 %v1473_v13, %v1425_v6 }
 0x1bb   :  { %1492 = vst [vmem:[%s3112_s2 + $0x70] sm:$0xff] %v1474_v20  ;;  %v1507_v12 = vadd.f32 %v1506_v14, %v1474_v20  ;;  %v1529_v10 = vmul.f32 %v1474_v20, %v1474_v20 }
 0x1bc   :  { %v1377_v47 = vpop.f32.mrf.mxu2 }
 0x1bd   :  { %v1544_v26 = vadd.f32 %v1543_v9, %v1529_v10  ;;  %v1378_v34 = vadd.f32 %v1377_v47, %v1329_v24 }
 0x1be   :  { %v1426_v25 = vpop.f32.mrf.mxu3 }
 0x1bf   :  { %v1427_v27 = vadd.f32 %v1426_v25, %v1378_v34 }
 0x1c1   :  { %v1476_v29 = vadd.f32 %v1475_v28, %v1427_v27 }
 0x1c3   :  { %1493 = vst [vmem:[%s3112_s2 + $0x78] sm:$0xff] %v1476_v29  ;;  %v1508_v30 = vadd.f32 %v1507_v12, %v1476_v29  ;;  %v1530_v31 = vmul.f32 %v1476_v29, %v1476_v29 }
 0x1c5   :  { %v1509_v32 = vrot.slane %v1508_v30, 4  ;;  %v1545_v11 = vadd.f32 %v1544_v26, %v1530_v31 }
 0x1c7   :  { %v1510_v35 = vadd.f32 %v1509_v32, %v1508_v30  ;;  %v1546_v8 = vrot.slane %v1545_v11, 4 }
 0x1c9   :  { %v1511_v36 = vrot.slane %v1510_v35, 2  ;;  %v1547_v38 = vadd.f32 %v1546_v8, %v1545_v11 }
 0x1cb   :  { %v1512_v33 = vadd.f32 %v1511_v36, %v1510_v35  ;;  %v1548_v44 = vrot.slane %v1547_v38, 2 }
 0x1cd   :  { %v1513_v22 = vrot.slane %v1512_v33, 1  ;;  %v1549_v39 = vadd.f32 %v1548_v44, %v1547_v38 }
 0x1cf   :  { %v1550_v41 = vrot.slane %v1549_v39, 1  ;;  %v1514_v43 = vadd.f32 %v1513_v22, %v1512_v33 }
 0x1d1   :  { %v1551_v23 = vadd.f32 %v1550_v41, %v1549_v39 }
 0x1d3   :  { %v1553_v50 = vsel %vm1552_vm0, %v1514_v43, %v1551_v23 }
 0x1d4   :  { %1554 = vst [vmem:[%s3113_s3] sm:$0x3] %v1553_v50 }

</bundles_post_ra>
